<compile_context>
chip_gen: v5e
topology: v5e:2x2
jax: 0.10.0
libtpu: 0.0.40
codegen_flags: <defaults>
</compile_context>

<pallas_src>
import numpy as np
import jax
import jax.numpy as jnp
from jax.experimental import pallas as pl
from jax.experimental.pallas import tpu as pltpu

B, H, W = 2, 16, 20                   # small shapes; pool target fixed by module
C_OUT = 8
KH = KW = 3
K_TAPS = KH * KW                      # 9
HW = H * W                            # 320
POOL_H, POOL_W = 8, 10
POOL = POOL_H * POOL_W                # 80
FLAT = C_OUT * POOL                   # 640
HID = 500
N_CLS = 2


# ---------------------------------------------------------------------------
# Fused kernel: conv + ReLU + adaptive avg-pool + fc1 + ReLU + fc2
# ---------------------------------------------------------------------------
def detector_kernel(xkb_ref, wI_ref, bcb_ref, pool_ref, w1_hbm, b1_ref, w2_ref,
                    b2_ref, out_ref, w1_vmem, w1_sem):
    # Kick off the big fc1-weight fetch (HBM -> VMEM); hide it under conv/pool.
    w1_cp = pltpu.make_async_copy(w1_hbm, w1_vmem, w1_sem)
    w1_cp.start()

    # Conv as one MXU matmul covering both batch elements.
    # Rows of `act` are (channel, batch) pairs; columns are the H*W pixels.
    act = jnp.dot(wI_ref[...], xkb_ref[...],
                  preferred_element_type=jnp.float32)                 # (16, 320)
    act = jnp.maximum(act + bcb_ref[...], 0.0)                        # conv bias + ReLU

    # Adaptive avg-pool as one matmul with the precomputed pooling matrix.
    pooled = jnp.dot(act, pool_ref[...],
                     preferred_element_type=jnp.float32)              # (16, 80)

    w1_cp.wait()                                                      # fc1 weights ready

    # fc1: feats(B,640) @ w1T(640,500), expressed as a per-channel sum so the
    # (channel, pooled) features never need re-layout into a single 640-lane row.
    h = jnp.zeros((B, HID), jnp.float32)
    for c in range(C_OUT):
        p_c = pooled[c * B:(c + 1) * B, :]                            # (B, 80)
        w_c = w1_vmem[c * POOL:(c + 1) * POOL, :]                     # (80, 500)
        h = h + jnp.dot(p_c, w_c, preferred_element_type=jnp.float32)
    h = jnp.maximum(h + b1_ref[...], 0.0)                             # (B, 500)

    out_ref[...] = (jnp.dot(h, w2_ref[...], preferred_element_type=jnp.float32)
                    + b2_ref[...])                                    # (B, 2)


def detector_pallas(x_kb, w_I, b_cb, pool_mat, w1T, b1r, w2T, b2r):
    return pl.pallas_call(
        detector_kernel,
        out_shape=jax.ShapeDtypeStruct((B, N_CLS), jnp.float32),
        grid_spec=pltpu.PrefetchScalarGridSpec(
            num_scalar_prefetch=0,
            grid=(1,),
            in_specs=[
                pl.BlockSpec((K_TAPS * B, HW), lambda i: (0, 0)),         # im2col slab
                pl.BlockSpec((C_OUT * B, K_TAPS * B), lambda i: (0, 0)),  # kron(wc, I_B)
                pl.BlockSpec((C_OUT * B, 1), lambda i: (0, 0)),           # conv bias
                pl.BlockSpec((HW, POOL), lambda i: (0, 0)),               # pooling matrix
                pl.BlockSpec(memory_space=pl.ANY),                        # fc1 weight (HBM)
                pl.BlockSpec((1, HID), lambda i: (0, 0)),                 # fc1 bias
                pl.BlockSpec((HID, N_CLS), lambda i: (0, 0)),             # fc2 weight
                pl.BlockSpec((1, N_CLS), lambda i: (0, 0)),               # fc2 bias
            ],
            out_specs=pl.BlockSpec((B, N_CLS), lambda i: (0, 0)),
            scratch_shapes=[
                pltpu.VMEM((FLAT, HID), jnp.float32),     # fc1 weight landing buffer
                pltpu.SemaphoreType.DMA(()),
            ],
        ),
        compiler_params=pltpu.CompilerParams(dimension_semantics=("arbitrary",)),
    )(x_kb, w_I, b_cb, pool_mat, w1T, b1r, w2T, b2r)


# ---------------------------------------------------------------------------
# Glue: parameters, pooling matrix, forward, reference
# ---------------------------------------------------------------------------
def adaptive_avg_matrix(in_size, out_size):
    # Exactly replicates AdaptiveAvgPool2d window boundaries (floor/ceil).
    A = np.zeros((out_size, in_size), np.float32)
    for i in range(out_size):
        start = (i * in_size) // out_size
        end = -(-((i + 1) * in_size) // out_size)   # ceil division
        A[i, start:end] = 1.0 / (end - start)
    return A


# (H*W, POOL) matrix: pool_mat[h*W+w, p*POOL_W+q] = ah[p,h] * aw[q,w]
POOL_MAT = jnp.asarray(
    np.kron(adaptive_avg_matrix(H, POOL_H), adaptive_avg_matrix(W, POOL_W)).T)


def init_params(key):
    k = jax.random.split(key, 6)

    def unif(kk, shape, fan_in):
        bound = 1.0 / np.sqrt(fan_in)
        return jax.random.uniform(kk, shape, jnp.float32, -bound, bound)

    wc = unif(k[0], (C_OUT, 1, KH, KW), KH * KW)   # conv1.weight
    bc = unif(k[1], (C_OUT,), KH * KW)             # conv1.bias
    w1 = unif(k[2], (HID, FLAT), FLAT)             # fc1.weight (out, in)
    b1 = unif(k[3], (HID,), FLAT)                  # fc1.bias
    w2 = unif(k[4], (N_CLS, HID), HID)             # fc2.weight
    b2 = unif(k[5], (N_CLS,), HID)                 # fc2.bias
    return wc, bc, w1, b1, w2, b2


def prepare_params(params):
    # One-time layout plumbing of the weights (outside the per-call forward).
    wc, bc, w1, b1, w2, b2 = params
    wc2 = wc.reshape(C_OUT, K_TAPS)                                   # (8, 9)
    w_I = jnp.kron(wc2, jnp.eye(B, dtype=jnp.float32))                # (16, 18)
    b_cb = jnp.repeat(bc, B).reshape(C_OUT * B, 1)                    # (16, 1)
    w1T = w1.T                                                        # (640, 500)
    b1r = b1.reshape(1, HID)
    w2T = w2.T                                                        # (500, 2)
    b2r = b2.reshape(1, N_CLS)
    return w_I, b_cb, POOL_MAT, w1T, b1r, w2T, b2r


@jax.jit
def detector_forward(x, w_I, b_cb, pool_mat, w1T, b1r, w2T, b2r):
    # Tiny im2col slab (pure layout plumbing, ~23 KB): rows ordered (tap, batch).
    xpad = jnp.pad(x, ((0, 0), (1, 1), (1, 1)))                       # (B, H+2, W+2)
    taps = [xpad[:, kh:kh + H, kw:kw + W].reshape(B, 1, HW)
            for kh in range(KH) for kw in range(KW)]
    xcols = jnp.concatenate(taps, axis=1)                             # (B, 9, HW)
    x_kb = jnp.transpose(xcols, (1, 0, 2)).reshape(K_TAPS * B, HW)    # (18, 320)
    return detector_pallas(x_kb, w_I, b_cb, pool_mat, w1T, b1r, w2T, b2r)


def detector_reference(x, params):
    wc, bc, w1, b1, w2, b2 = params
    y = jax.lax.conv_general_dilated(
        x[:, None], wc, window_strides=(1, 1), padding="SAME",
        dimension_numbers=("NCHW", "OIHW", "NCHW"))
    y = jnp.maximum(y + bc[None, :, None, None], 0.0)
    ah = jnp.asarray(adaptive_avg_matrix(H, POOL_H))
    aw = jnp.asarray(adaptive_avg_matrix(W, POOL_W))
    pooled = jnp.einsum("bchw,ph,qw->bcpq", y, ah, aw)
    feats = pooled.reshape(B, FLAT)
    h = jnp.maximum(feats @ w1.T + b1, 0.0)
    return h @ w2.T + b2


if __name__ == "__main__":
    key = jax.random.PRNGKey(0)
    kx, kp = jax.random.split(key)
    x = jax.random.normal(kx, (B, H, W), jnp.float32)
    params = init_params(kp)
    prepped = prepare_params(params)

    out = detector_forward(x, *prepped)
    out = jax.block_until_ready(out)

    ref = detector_reference(x, params)
    np.testing.assert_allclose(np.asarray(out), np.asarray(ref), rtol=5e-4, atol=5e-4)
    print("KERNEL_OK")
</pallas_src>

<mosaic_0001>
module attributes {stable_mosaic.version = 11 : i64} {
  func.func @detector_kernel(%arg0: i32, %arg1: memref<18x320xf32, #tpu.memory_space<vmem>>, %arg2: memref<16x18xf32, #tpu.memory_space<vmem>>, %arg3: memref<16x1xf32, #tpu.memory_space<vmem>>, %arg4: memref<320x80xf32, #tpu.memory_space<vmem>>, %arg5: memref<640x500xf32, #tpu.memory_space<any>>, %arg6: memref<1x500xf32, #tpu.memory_space<vmem>>, %arg7: memref<500x2xf32, #tpu.memory_space<vmem>>, %arg8: memref<1x2xf32, #tpu.memory_space<vmem>>, %arg9: memref<2x2xf32, #tpu.memory_space<vmem>>, %arg10: memref<640x500xf32, #tpu.memory_space<vmem>>, %arg11: memref<!tpu.dma_semaphore, #tpu.memory_space<semaphore_mem>>) attributes {dimension_semantics = [#tpu.dimension_semantics<arbitrary>], iteration_bounds = array<i64: 1>, scalar_prefetch = 0 : i64, scratch_operands = 2 : i64, tpu.core_type = #tpu.core_type<tc>, window_params = [{pipeline_mode = #tpu.pipeline_mode<synchronous>, transform_indices = @transform_0, window_bounds = array<i64: 18, 320>}, {pipeline_mode = #tpu.pipeline_mode<synchronous>, transform_indices = @transform_1, window_bounds = array<i64: 16, 18>}, {pipeline_mode = #tpu.pipeline_mode<synchronous>, transform_indices = @transform_2, window_bounds = array<i64: 16, 1>}, {pipeline_mode = #tpu.pipeline_mode<synchronous>, transform_indices = @transform_3, window_bounds = array<i64: 320, 80>}, {}, {pipeline_mode = #tpu.pipeline_mode<synchronous>, transform_indices = @transform_5, window_bounds = array<i64: 1, 500>}, {pipeline_mode = #tpu.pipeline_mode<synchronous>, transform_indices = @transform_6, window_bounds = array<i64: 500, 2>}, {pipeline_mode = #tpu.pipeline_mode<synchronous>, transform_indices = @transform_7, window_bounds = array<i64: 1, 2>}, {pipeline_mode = #tpu.pipeline_mode<synchronous>, transform_indices = @transform_8, window_bounds = array<i64: 2, 2>}]} {
    tpu.enqueue_dma source(%arg5 : memref<640x500xf32, #tpu.memory_space<any>>) target(%arg10 : memref<640x500xf32, #tpu.memory_space<vmem>>) target_semaphore(%arg11 : memref<!tpu.dma_semaphore, #tpu.memory_space<semaphore_mem>>)
    %c0 = arith.constant 0 : index
    %c0_0 = arith.constant 0 : index
    %0 = vector.load %arg2[%c0, %c0_0] : memref<16x18xf32, #tpu.memory_space<vmem>>, vector<16x18xf32>
    %c0_1 = arith.constant 0 : index
    %c0_2 = arith.constant 0 : index
    %1 = vector.load %arg1[%c0_1, %c0_2] : memref<18x320xf32, #tpu.memory_space<vmem>>, vector<18x320xf32>
    %cst = arith.constant dense<0.000000e+00> : vector<16x320xf32>
    %2 = tpu.matmul %0, %1, %cst {dimension_numbers = #tpu.dot_dimension_numbers<[1], [0], [0], [1], [0, 0, 1, 1], [], []>} : vector<16x18xf32>, vector<18x320xf32>, vector<16x320xf32> -> vector<16x320xf32>
    %c0_3 = arith.constant 0 : index
    %c0_4 = arith.constant 0 : index
    %3 = vector.load %arg3[%c0_3, %c0_4] : memref<16x1xf32, #tpu.memory_space<vmem>>, vector<16x1xf32>
    %4 = vector.broadcast %3 : vector<16x1xf32> to vector<16x320xf32>
    %5 = arith.addf %2, %4 : vector<16x320xf32>
    %cst_5 = arith.constant 0.000000e+00 : f32
    %6 = vector.broadcast %cst_5 : f32 to vector<16x320xf32>
    %7 = arith.maximumf %5, %6 : vector<16x320xf32>
    %c0_6 = arith.constant 0 : index
    %c0_7 = arith.constant 0 : index
    %8 = vector.load %arg4[%c0_6, %c0_7] : memref<320x80xf32, #tpu.memory_space<vmem>>, vector<320x80xf32>
    %cst_8 = arith.constant dense<0.000000e+00> : vector<16x80xf32>
    %9 = tpu.matmul %7, %8, %cst_8 {dimension_numbers = #tpu.dot_dimension_numbers<[1], [0], [0], [1], [0, 0, 1, 1], [], []>} : vector<16x320xf32>, vector<320x80xf32>, vector<16x80xf32> -> vector<16x80xf32>
    tpu.wait_dma2 semaphore(%arg11 : memref<!tpu.dma_semaphore, #tpu.memory_space<semaphore_mem>>) src(%arg5 : memref<640x500xf32, #tpu.memory_space<any>>) dst(%arg10 : memref<640x500xf32, #tpu.memory_space<vmem>>)
    %cst_9 = arith.constant 0.000000e+00 : f32
    %10 = vector.broadcast %cst_9 : f32 to vector<2x500xf32>
    %11 = vector.extract_strided_slice %9 {offsets = [0, 0], sizes = [2, 80], strides = [1, 1]} : vector<16x80xf32> to vector<2x80xf32>
    %c0_10 = arith.constant 0 : index
    %c0_11 = arith.constant 0 : index
    %12 = vector.load %arg10[%c0_10, %c0_11] : memref<640x500xf32, #tpu.memory_space<vmem>>, vector<80x500xf32>
    %cst_12 = arith.constant dense<0.000000e+00> : vector<2x500xf32>
    %13 = tpu.matmul %11, %12, %cst_12 {dimension_numbers = #tpu.dot_dimension_numbers<[1], [0], [0], [1], [0, 0, 1, 1], [], []>} : vector<2x80xf32>, vector<80x500xf32>, vector<2x500xf32> -> vector<2x500xf32>
    %14 = arith.addf %10, %13 : vector<2x500xf32>
    %15 = vector.extract_strided_slice %9 {offsets = [2, 0], sizes = [2, 80], strides = [1, 1]} : vector<16x80xf32> to vector<2x80xf32>
    %c80 = arith.constant 80 : index
    %c0_13 = arith.constant 0 : index
    %16 = vector.load %arg10[%c80, %c0_13] : memref<640x500xf32, #tpu.memory_space<vmem>>, vector<80x500xf32>
    %cst_14 = arith.constant dense<0.000000e+00> : vector<2x500xf32>
    %17 = tpu.matmul %15, %16, %cst_14 {dimension_numbers = #tpu.dot_dimension_numbers<[1], [0], [0], [1], [0, 0, 1, 1], [], []>} : vector<2x80xf32>, vector<80x500xf32>, vector<2x500xf32> -> vector<2x500xf32>
    %18 = arith.addf %14, %17 : vector<2x500xf32>
    %19 = vector.extract_strided_slice %9 {offsets = [4, 0], sizes = [2, 80], strides = [1, 1]} : vector<16x80xf32> to vector<2x80xf32>
    %c160 = arith.constant 160 : index
    %c0_15 = arith.constant 0 : index
    %20 = vector.load %arg10[%c160, %c0_15] : memref<640x500xf32, #tpu.memory_space<vmem>>, vector<80x500xf32>
    %cst_16 = arith.constant dense<0.000000e+00> : vector<2x500xf32>
    %21 = tpu.matmul %19, %20, %cst_16 {dimension_numbers = #tpu.dot_dimension_numbers<[1], [0], [0], [1], [0, 0, 1, 1], [], []>} : vector<2x80xf32>, vector<80x500xf32>, vector<2x500xf32> -> vector<2x500xf32>
    %22 = arith.addf %18, %21 : vector<2x500xf32>
    %23 = vector.extract_strided_slice %9 {offsets = [6, 0], sizes = [2, 80], strides = [1, 1]} : vector<16x80xf32> to vector<2x80xf32>
    %c240 = arith.constant 240 : index
    %c0_17 = arith.constant 0 : index
    %24 = vector.load %arg10[%c240, %c0_17] : memref<640x500xf32, #tpu.memory_space<vmem>>, vector<80x500xf32>
    %cst_18 = arith.constant dense<0.000000e+00> : vector<2x500xf32>
    %25 = tpu.matmul %23, %24, %cst_18 {dimension_numbers = #tpu.dot_dimension_numbers<[1], [0], [0], [1], [0, 0, 1, 1], [], []>} : vector<2x80xf32>, vector<80x500xf32>, vector<2x500xf32> -> vector<2x500xf32>
    %26 = arith.addf %22, %25 : vector<2x500xf32>
    %27 = vector.extract_strided_slice %9 {offsets = [8, 0], sizes = [2, 80], strides = [1, 1]} : vector<16x80xf32> to vector<2x80xf32>
    %c320 = arith.constant 320 : index
    %c0_19 = arith.constant 0 : index
    %28 = vector.load %arg10[%c320, %c0_19] : memref<640x500xf32, #tpu.memory_space<vmem>>, vector<80x500xf32>
    %cst_20 = arith.constant dense<0.000000e+00> : vector<2x500xf32>
    %29 = tpu.matmul %27, %28, %cst_20 {dimension_numbers = #tpu.dot_dimension_numbers<[1], [0], [0], [1], [0, 0, 1, 1], [], []>} : vector<2x80xf32>, vector<80x500xf32>, vector<2x500xf32> -> vector<2x500xf32>
    %30 = arith.addf %26, %29 : vector<2x500xf32>
    %31 = vector.extract_strided_slice %9 {offsets = [10, 0], sizes = [2, 80], strides = [1, 1]} : vector<16x80xf32> to vector<2x80xf32>
    %c400 = arith.constant 400 : index
    %c0_21 = arith.constant 0 : index
    %32 = vector.load %arg10[%c400, %c0_21] : memref<640x500xf32, #tpu.memory_space<vmem>>, vector<80x500xf32>
    %cst_22 = arith.constant dense<0.000000e+00> : vector<2x500xf32>
    %33 = tpu.matmul %31, %32, %cst_22 {dimension_numbers = #tpu.dot_dimension_numbers<[1], [0], [0], [1], [0, 0, 1, 1], [], []>} : vector<2x80xf32>, vector<80x500xf32>, vector<2x500xf32> -> vector<2x500xf32>
    %34 = arith.addf %30, %33 : vector<2x500xf32>
    %35 = vector.extract_strided_slice %9 {offsets = [12, 0], sizes = [2, 80], strides = [1, 1]} : vector<16x80xf32> to vector<2x80xf32>
    %c480 = arith.constant 480 : index
    %c0_23 = arith.constant 0 : index
    %36 = vector.load %arg10[%c480, %c0_23] : memref<640x500xf32, #tpu.memory_space<vmem>>, vector<80x500xf32>
    %cst_24 = arith.constant dense<0.000000e+00> : vector<2x500xf32>
    %37 = tpu.matmul %35, %36, %cst_24 {dimension_numbers = #tpu.dot_dimension_numbers<[1], [0], [0], [1], [0, 0, 1, 1], [], []>} : vector<2x80xf32>, vector<80x500xf32>, vector<2x500xf32> -> vector<2x500xf32>
    %38 = arith.addf %34, %37 : vector<2x500xf32>
    %39 = vector.extract_strided_slice %9 {offsets = [14, 0], sizes = [2, 80], strides = [1, 1]} : vector<16x80xf32> to vector<2x80xf32>
    %c560 = arith.constant 560 : index
    %c0_25 = arith.constant 0 : index
    %40 = vector.load %arg10[%c560, %c0_25] : memref<640x500xf32, #tpu.memory_space<vmem>>, vector<80x500xf32>
    %cst_26 = arith.constant dense<0.000000e+00> : vector<2x500xf32>
    %41 = tpu.matmul %39, %40, %cst_26 {dimension_numbers = #tpu.dot_dimension_numbers<[1], [0], [0], [1], [0, 0, 1, 1], [], []>} : vector<2x80xf32>, vector<80x500xf32>, vector<2x500xf32> -> vector<2x500xf32>
    %42 = arith.addf %38, %41 : vector<2x500xf32>
    %c0_27 = arith.constant 0 : index
    %c0_28 = arith.constant 0 : index
    %43 = vector.load %arg6[%c0_27, %c0_28] : memref<1x500xf32, #tpu.memory_space<vmem>>, vector<1x500xf32>
    %44 = vector.broadcast %43 : vector<1x500xf32> to vector<2x500xf32>
    %45 = arith.addf %42, %44 : vector<2x500xf32>
    %cst_29 = arith.constant 0.000000e+00 : f32
    %46 = vector.broadcast %cst_29 : f32 to vector<2x500xf32>
    %47 = arith.maximumf %45, %46 : vector<2x500xf32>
    %c0_30 = arith.constant 0 : index
    %c0_31 = arith.constant 0 : index
    %48 = vector.load %arg7[%c0_30, %c0_31] : memref<500x2xf32, #tpu.memory_space<vmem>>, vector<500x2xf32>
    %cst_32 = arith.constant dense<0.000000e+00> : vector<2x2xf32>
    %49 = tpu.matmul %47, %48, %cst_32 {dimension_numbers = #tpu.dot_dimension_numbers<[1], [0], [0], [1], [0, 0, 1, 1], [], []>} : vector<2x500xf32>, vector<500x2xf32>, vector<2x2xf32> -> vector<2x2xf32>
    %c0_33 = arith.constant 0 : index
    %c0_34 = arith.constant 0 : index
    %50 = vector.load %arg8[%c0_33, %c0_34] : memref<1x2xf32, #tpu.memory_space<vmem>>, vector<1x2xf32>
    %51 = vector.broadcast %50 : vector<1x2xf32> to vector<2x2xf32>
    %52 = arith.addf %49, %51 : vector<2x2xf32>
    %c0_35 = arith.constant 0 : index
    %c0_36 = arith.constant 0 : index
    %53 = vector.load %arg9[%c0_35, %c0_36] : memref<2x2xf32, #tpu.memory_space<vmem>>, vector<2x2xf32>
    tpu.vector_store %arg9[%c0_35, %c0_36], %52 {strides = array<i32>} : memref<2x2xf32, #tpu.memory_space<vmem>>, vector<2x2xf32>,
    return
  }
  func.func @transform_0(%arg0: i32) -> (i32, i32) {
    %c0_i32 = arith.constant 0 : i32
    %c0_i32_0 = arith.constant 0 : i32
    %c0_i32_1 = arith.constant 0 : i32
    return %c0_i32, %c0_i32_0 : i32, i32
  }
  func.func @transform_1(%arg0: i32) -> (i32, i32) {
    %c0_i32 = arith.constant 0 : i32
    %c0_i32_0 = arith.constant 0 : i32
    %c0_i32_1 = arith.constant 0 : i32
    return %c0_i32, %c0_i32_0 : i32, i32
  }
  func.func @transform_2(%arg0: i32) -> (i32, i32) {
    %c0_i32 = arith.constant 0 : i32
    %c0_i32_0 = arith.constant 0 : i32
    %c0_i32_1 = arith.constant 0 : i32
    return %c0_i32, %c0_i32_0 : i32, i32
  }
  func.func @transform_3(%arg0: i32) -> (i32, i32) {
    %c0_i32 = arith.constant 0 : i32
    %c0_i32_0 = arith.constant 0 : i32
    %c0_i32_1 = arith.constant 0 : i32
    return %c0_i32, %c0_i32_0 : i32, i32
  }
  func.func @transform_5(%arg0: i32) -> (i32, i32) {
    %c0_i32 = arith.constant 0 : i32
    %c0_i32_0 = arith.constant 0 : i32
    %c0_i32_1 = arith.constant 0 : i32
    return %c0_i32, %c0_i32_0 : i32, i32
  }
  func.func @transform_6(%arg0: i32) -> (i32, i32) {
    %c0_i32 = arith.constant 0 : i32
    %c0_i32_0 = arith.constant 0 : i32
    %c0_i32_1 = arith.constant 0 : i32
    return %c0_i32, %c0_i32_0 : i32, i32
  }
  func.func @transform_7(%arg0: i32) -> (i32, i32) {
    %c0_i32 = arith.constant 0 : i32
    %c0_i32_0 = arith.constant 0 : i32
    %c0_i32_1 = arith.constant 0 : i32
    return %c0_i32, %c0_i32_0 : i32, i32
  }
  func.func @transform_8(%arg0: i32) -> (i32, i32) {
    %c0_i32 = arith.constant 0 : i32
    %c0_i32_0 = arith.constant 0 : i32
    %c0_i32_1 = arith.constant 0 : i32
    return %c0_i32, %c0_i32_0 : i32, i32
  }
}

</mosaic_0001>

<bundles_post_ra>
// kernel: detector_forward.1
= control target key start
LH: loop header
LB: loop body
LE: loop exit
PB: predicated region body
PF: predicated region fallthrough
CT: control target
= control target key end

     0   :  { %13 = vsyncpa [#allocation5], 0  ;;  %s4653_s0 = inlined_call_operand.vmem [shape: f32[18,320], index: 0, kind: input, shape index: {}]   ;;  %s4654_s1 = inlined_call_operand.vmem [shape: f32[16,18], index: 1, kind: input, shape index: {}]   ;;  %s4655_s2 = inlined_call_operand.vmem [shape: f32[16,1], index: 2, kind: input, shape index: {}]   ;;  %s4656_s3 = inlined_call_operand.vmem [shape: f32[320,80], index: 3, kind: input, shape index: {}]   ;;  %s4657_s4 = inlined_call_operand.vmem [shape: f32[640,500], index: 4, kind: input, shape index: {}]   ;;  %s4658_s5 = inlined_call_operand.vmem [shape: f32[1,500], index: 5, kind: input, shape index: {}]   ;;  %s4659_s6 = inlined_call_operand.vmem [shape: f32[500,2], index: 6, kind: input, shape index: {}]   ;;  %s4660_s7 = inlined_call_operand.vmem [shape: f32[1,2], index: 7, kind: input, shape index: {}]   ;;  %s4661_s8 = inlined_call_operand.hbm [shape: f32[2,2], index: 8, kind: output, shape index: {}]  }
   0x1   :  { %v2257_v0 = vld [vmem:[%s4657_s4] sm:$0xff]  ;;  %v2262_v1 = vld [vmem:[%s4657_s4 + $0x8] sm:$0xff]  ;;  %v2267_v2 = vld [vmem:[%s4657_s4 + $0x10] sm:$0xff] }
   0x2   :  { %4662 = vst [vmem:[#allocation9_spill] sm:$0xff] %v2262_v1  ;;  %v2272_v3 = vld [vmem:[%s4657_s4 + $0x18] sm:$0xff]  ;;  %v2277_v4 = vld [vmem:[%s4657_s4 + $0x20] sm:$0xff]  ;;  %v2282_v5 = vld [vmem:[%s4657_s4 + $0x28] sm:$0xff] }
   0x3   :  { %4663 = vst [vmem:[#allocation10_spill] sm:$0xff] %v2267_v2  ;;  %v2287_v6 = vld [vmem:[%s4657_s4 + $0x30] sm:$0xff]  ;;  %v2292_v7 = vld [vmem:[%s4657_s4 + $0x38] sm:$0xff]  ;;  %v2297_v8 = vld [vmem:[%s4657_s4 + $0x40] sm:$0xff] }
   0x4   :  { %4664 = vst [vmem:[#allocation11_spill] sm:$0xff] %v2272_v3  ;;  %v2302_v9 = vld [vmem:[%s4657_s4 + $0x48] sm:$0xff]  ;;  %v2307_v10 = vld [vmem:[%s4657_s4 + $0x50] sm:$0xff]  ;;  %v2312_v11 = vld [vmem:[%s4657_s4 + $0x58] sm:$0xff] }
   0x5   :  { %4665 = vst [vmem:[#allocation12_spill] sm:$0xff] %v2282_v5  ;;  %v2317_v12 = vld [vmem:[%s4657_s4 + $0x60] sm:$0xff]  ;;  %v2322_v13 = vld [vmem:[%s4657_s4 + $0x68] sm:$0xff]  ;;  %v2327_v14 = vld [vmem:[%s4657_s4 + $0x70] sm:$0xff] }
   0x6   :  { %4666 = vst [vmem:[#allocation13_spill] sm:$0xff] %v2287_v6  ;;  %v2332_v15 = vld [vmem:[%s4657_s4 + $0x78] sm:$0xff]  ;;  %v2337_v16 = vld [vmem:[%s4657_s4 + $0x80] sm:$0xff]  ;;  %v2342_v17 = vld [vmem:[%s4657_s4 + $0x88] sm:$0xff] }
   0x7   :  { %4667 = vst [vmem:[#allocation14_spill] sm:$0xff] %v2292_v7  ;;  %v2347_v18 = vld [vmem:[%s4657_s4 + $0x90] sm:$0xff]  ;;  %v2352_v19 = vld [vmem:[%s4657_s4 + $0x98] sm:$0xff]  ;;  %v2357_v20 = vld [vmem:[%s4657_s4 + $0xa0] sm:$0xff] }
   0x8   :  { %4668 = vst [vmem:[#allocation15_spill] sm:$0xff] %v2302_v9  ;;  %v2362_v21 = vld [vmem:[%s4657_s4 + $0xa8] sm:$0xff]  ;;  %v2367_v22 = vld [vmem:[%s4657_s4 + $0xb0] sm:$0xff]  ;;  %v2372_v23 = vld [vmem:[%s4657_s4 + $0xb8] sm:$0xff] }
   0x9   :  { %4669 = vst [vmem:[#allocation16_spill] sm:$0xff] %v2307_v10  ;;  %v2377_v24 = vld [vmem:[%s4657_s4 + $0xc0] sm:$0xff]  ;;  %v2382_v25 = vld [vmem:[%s4657_s4 + $0xc8] sm:$0xff]  ;;  %v2387_v26 = vld [vmem:[%s4657_s4 + $0xd0] sm:$0xff] }
   0xa   :  { %4670 = vst [vmem:[#allocation17_spill] sm:$0xff] %v2312_v11  ;;  %v2392_v27 = vld [vmem:[%s4657_s4 + $0xd8] sm:$0xff]  ;;  %v2397_v28 = vld [vmem:[%s4657_s4 + $0xe0] sm:$0xff]  ;;  %v2402_v29 = vld [vmem:[%s4657_s4 + $0xe8] sm:$0xff] }
   0xb   :  { %4671 = vst [vmem:[#allocation18_spill] sm:$0xff] %v2322_v13  ;;  %v2407_v30 = vld [vmem:[%s4657_s4 + $0xf0] sm:$0xff]  ;;  %v2412_v31 = vld [vmem:[%s4657_s4 + $0xf8] sm:$0xff]  ;;  %v2417_v32 = vld [vmem:[%s4657_s4 + $0x100] sm:$0xff] }
   0xc   :  { %4672 = vst [vmem:[#allocation19_spill] sm:$0xff] %v2327_v14  ;;  %v2422_v33 = vld [vmem:[%s4657_s4 + $0x108] sm:$0xff]  ;;  %v2427_v34 = vld [vmem:[%s4657_s4 + $0x110] sm:$0xff]  ;;  %v2432_v35 = vld [vmem:[%s4657_s4 + $0x118] sm:$0xff] }
   0xd   :  { %4673 = vst [vmem:[#allocation20_spill] sm:$0xff] %v2332_v15  ;;  %v2437_v36 = vld [vmem:[%s4657_s4 + $0x120] sm:$0xff]  ;;  %v2442_v37 = vld [vmem:[%s4657_s4 + $0x128] sm:$0xff]  ;;  %v2447_v38 = vld [vmem:[%s4657_s4 + $0x130] sm:$0xff] }
   0xe   :  { %4674 = vst [vmem:[#allocation21_spill] sm:$0xff] %v2342_v17  ;;  %v2452_v39 = vld [vmem:[%s4657_s4 + $0x138] sm:$0xff]  ;;  %v2457_v40 = vld [vmem:[%s4657_s4 + $0x140] sm:$0xff]  ;;  %v2462_v41 = vld [vmem:[%s4657_s4 + $0x148] sm:$0xff] }
   0xf   :  { %4675 = vst [vmem:[#allocation22_spill] sm:$0xff] %v2347_v18  ;;  %v2467_v42 = vld [vmem:[%s4657_s4 + $0x150] sm:$0xff]  ;;  %v2472_v43 = vld [vmem:[%s4657_s4 + $0x158] sm:$0xff]  ;;  %v2477_v44 = vld [vmem:[%s4657_s4 + $0x160] sm:$0xff] }
  0x10   :  { %4676 = vst [vmem:[#allocation23_spill] sm:$0xff] %v2352_v19  ;;  %v2482_v45 = vld [vmem:[%s4657_s4 + $0x168] sm:$0xff]  ;;  %v2487_v46 = vld [vmem:[%s4657_s4 + $0x170] sm:$0xff]  ;;  %v2492_v47 = vld [vmem:[%s4657_s4 + $0x178] sm:$0xff] }
  0x11   :  { %4677 = vst [vmem:[#allocation24_spill] sm:$0xff] %v2362_v21  ;;  %v2497_v48 = vld [vmem:[%s4657_s4 + $0x180] sm:$0xff]  ;;  %v2502_v49 = vld [vmem:[%s4657_s4 + $0x188] sm:$0xff]  ;;  %v2507_v50 = vld [vmem:[%s4657_s4 + $0x190] sm:$0xff] }
  0x12   :  { %4678 = vst [vmem:[#allocation25_spill] sm:$0xff] %v2367_v22  ;;  %v2512_v51 = vld [vmem:[%s4657_s4 + $0x198] sm:$0xff]  ;;  %v2517_v52 = vld [vmem:[%s4657_s4 + $0x1a0] sm:$0xff]  ;;  %v2522_v53 = vld [vmem:[%s4657_s4 + $0x1a8] sm:$0xff] }
  0x13   :  { %4679 = vst [vmem:[#allocation26_spill] sm:$0xff] %v2372_v23  ;;  %v2527_v54 = vld [vmem:[%s4657_s4 + $0x1b0] sm:$0xff]  ;;  %v2532_v55 = vld [vmem:[%s4657_s4 + $0x1b8] sm:$0xff]  ;;  %v2537_v56 = vld [vmem:[%s4657_s4 + $0x1c0] sm:$0xff] }
  0x14   :  { %4680 = vst [vmem:[#allocation27_spill] sm:$0xff] %v2382_v25  ;;  %v2542_v57 = vld [vmem:[%s4657_s4 + $0x1c8] sm:$0xff]  ;;  %v2547_v58 = vld [vmem:[%s4657_s4 + $0x1d0] sm:$0xff]  ;;  %v2552_v59 = vld [vmem:[%s4657_s4 + $0x1d8] sm:$0xff] }
  0x15   :  { %4681 = vst [vmem:[#allocation28_spill] sm:$0xff] %v2387_v26  ;;  %v2557_v60 = vld [vmem:[%s4657_s4 + $0x1e0] sm:$0xff]  ;;  %v2562_v61 = vld [vmem:[%s4657_s4 + $0x1e8] sm:$0xff]  ;;  %v2567_v62 = vld [vmem:[%s4657_s4 + $0x1f0] sm:$0xff] }
  0x16   :  { %4682 = vst [vmem:[#allocation29_spill] sm:$0xff] %v2392_v27  ;;  %v2572_v63 = vld [vmem:[%s4657_s4 + $0x1f8] sm:$0xff]  ;;  %v2577_v2 = vld [vmem:[%s4657_s4 + $0x200] sm:$0xff]  ;;  %v2582_v6 = vld [vmem:[%s4657_s4 + $0x208] sm:$0xff] }
  0x17   :  { %4683 = vst [vmem:[#allocation30_spill] sm:$0xff] %v2402_v29  ;;  %v2587_v10 = vld [vmem:[%s4657_s4 + $0x210] sm:$0xff]  ;;  %v2592_v14 = vld [vmem:[%s4657_s4 + $0x218] sm:$0xff]  ;;  %v2597_v18 = vld [vmem:[%s4657_s4 + $0x220] sm:$0xff] }
  0x18   :  { %4684 = vst [vmem:[#allocation31_spill] sm:$0xff] %v2407_v30  ;;  %v2602_v22 = vld [vmem:[%s4657_s4 + $0x228] sm:$0xff]  ;;  %v2607_v26 = vld [vmem:[%s4657_s4 + $0x230] sm:$0xff]  ;;  %v2612_v30 = vld [vmem:[%s4657_s4 + $0x238] sm:$0xff] }
  0x19   :  { %4685 = vst [vmem:[#allocation32_spill] sm:$0xff] %v2412_v31  ;;  %v2627_v3 = vld [vmem:[%s4657_s4 + $0x250] sm:$0xff]  ;;  %v2632_v1 = vld [vmem:[%s4657_s4 + $0x258] sm:$0xff]  ;;  %v2642_v7 = vld [vmem:[%s4657_s4 + $0x268] sm:$0xff] }
  0x1a   :  { %4686 = vst [vmem:[#allocation33_spill] sm:$0xff] %v2422_v33  ;;  %v2647_v5 = vld [vmem:[%s4657_s4 + $0x270] sm:$0xff]  ;;  %v2657_v11 = vld [vmem:[%s4657_s4 + $0x280] sm:$0xff]  ;;  %v2662_v9 = vld [vmem:[%s4657_s4 + $0x288] sm:$0xff] }
  0x1b   :  { %4687 = vst [vmem:[#allocation34_spill] sm:$0xff] %v2427_v34  ;;  %v2617_v34 = vld [vmem:[%s4657_s4 + $0x240] sm:$0xff]  ;;  %v2672_v15 = vld [vmem:[%s4657_s4 + $0x298] sm:$0xff]  ;;  %v2802_v19 = vld [vmem:[%s4657_s4 + $0x368] sm:$0xff] }
  0x1c   :  { %4688 = vst [vmem:[#allocation35_spill] sm:$0xff] %v2432_v35  ;;  %v2677_v13 = vld [vmem:[%s4657_s4 + $0x2a0] sm:$0xff]  ;;  %v2822_v17 = vld [vmem:[%s4657_s4 + $0x388] sm:$0xff] }
  0x1d   :  { %4689 = vst [vmem:[#allocation36_spill] sm:$0xff] %v2447_v38  ;;  %v2622_v38 = vld [vmem:[%s4657_s4 + $0x248] sm:$0xff] }
  0x1e   :  { %4690 = vst [vmem:[#allocation37_spill] sm:$0xff] %v2467_v42  ;;  %v2637_v42 = vld [vmem:[%s4657_s4 + $0x260] sm:$0xff] }
  0x1f   :  { %4691 = vst [vmem:[#allocation38_spill] sm:$0xff] %v2487_v46  ;;  %v2652_v46 = vld [vmem:[%s4657_s4 + $0x278] sm:$0xff] }
  0x20   :  { %4692 = vst [vmem:[#allocation39_spill] sm:$0xff] %v2507_v50  ;;  %v2667_v50 = vld [vmem:[%s4657_s4 + $0x290] sm:$0xff] }
  0x21   :  { %4693 = vst [vmem:[#allocation40_spill] sm:$0xff] %v2527_v54  ;;  %v2762_v54 = vld [vmem:[%s4657_s4 + $0x328] sm:$0xff] }
  0x22   :  { %4694 = vst [vmem:[#allocation41_spill] sm:$0xff] %v2547_v58  ;;  %v2842_v58 = vld [vmem:[%s4657_s4 + $0x3a8] sm:$0xff] }
  0x23   :  { %4695 = vst [vmem:[#allocation42_spill] sm:$0xff] %v2567_v62 }
  0x24   :  { %4696 = vst [vmem:[#allocation43_spill] sm:$0xff] %v2587_v10 }
  0x25   :  { %4697 = vst [vmem:[#allocation44_spill] sm:$0xff] %v2607_v26 }
  0x26   :  { %4698 = vst [vmem:[#allocation45_spill] sm:$0xff] %v2657_v11  ;;  %v2682_v11 = vld [vmem:[%s4657_s4 + $0x2a8] sm:$0xff] }
  0x27   :  { %4699 = vst [vmem:[#allocation46_spill] sm:$0xff] %v2662_v9  ;;  %v2687_v9 = vld [vmem:[%s4657_s4 + $0x2b0] sm:$0xff] }
  0x28   :  { %4700 = vst [vmem:[#allocation47_spill] sm:$0xff] %v2667_v50  ;;  %v2692_v50 = vld [vmem:[%s4657_s4 + $0x2b8] sm:$0xff] }
  0x29   :  { %4701 = vst [vmem:[#allocation48_spill] sm:$0xff] %v2672_v15  ;;  %v2697_v15 = vld [vmem:[%s4657_s4 + $0x2c0] sm:$0xff] }
  0x2a   :  { %4702 = vst [vmem:[#allocation49_spill] sm:$0xff] %v2677_v13  ;;  %v2702_v13 = vld [vmem:[%s4657_s4 + $0x2c8] sm:$0xff] }
  0x2b   :  { %4703 = vst [vmem:[#allocation50_spill] sm:$0xff] %v2682_v11  ;;  %v2707_v11 = vld [vmem:[%s4657_s4 + $0x2d0] sm:$0xff] }
  0x2c   :  { %4704 = vst [vmem:[#allocation51_spill] sm:$0xff] %v2687_v9  ;;  %v2712_v9 = vld [vmem:[%s4657_s4 + $0x2d8] sm:$0xff] }
  0x2d   :  { %4705 = vst [vmem:[#allocation52_spill] sm:$0xff] %v2692_v50  ;;  %v2717_v50 = vld [vmem:[%s4657_s4 + $0x2e0] sm:$0xff] }
  0x2e   :  { %4706 = vst [vmem:[#allocation53_spill] sm:$0xff] %v2697_v15  ;;  %v2722_v15 = vld [vmem:[%s4657_s4 + $0x2e8] sm:$0xff] }
  0x2f   :  { %4707 = vst [vmem:[#allocation54_spill] sm:$0xff] %v2702_v13  ;;  %v2727_v13 = vld [vmem:[%s4657_s4 + $0x2f0] sm:$0xff] }
  0x30   :  { %4708 = vst [vmem:[#allocation55_spill] sm:$0xff] %v2707_v11  ;;  %v2732_v11 = vld [vmem:[%s4657_s4 + $0x2f8] sm:$0xff] }
  0x31   :  { %4709 = vst [vmem:[#allocation56_spill] sm:$0xff] %v2712_v9  ;;  %v2737_v9 = vld [vmem:[%s4657_s4 + $0x300] sm:$0xff] }
  0x32   :  { %4710 = vst [vmem:[#allocation57_spill] sm:$0xff] %v2717_v50  ;;  %v2742_v50 = vld [vmem:[%s4657_s4 + $0x308] sm:$0xff] }
  0x33   :  { %4711 = vst [vmem:[#allocation58_spill] sm:$0xff] %v2722_v15  ;;  %v2747_v15 = vld [vmem:[%s4657_s4 + $0x310] sm:$0xff] }
  0x34   :  { %4712 = vst [vmem:[#allocation59_spill] sm:$0xff] %v2727_v13  ;;  %v2752_v13 = vld [vmem:[%s4657_s4 + $0x318] sm:$0xff] }
  0x35   :  { %4713 = vst [vmem:[#allocation60_spill] sm:$0xff] %v2732_v11  ;;  %v2757_v11 = vld [vmem:[%s4657_s4 + $0x320] sm:$0xff] }
  0x36   :  { %4714 = vst [vmem:[#allocation61_spill] sm:$0xff] %v2737_v9  ;;  %v2782_v9 = vld [vmem:[%s4657_s4 + $0x348] sm:$0xff] }
  0x37   :  { %4715 = vst [vmem:[#allocation62_spill] sm:$0xff] %v2742_v50  ;;  %v2767_v50 = vld [vmem:[%s4657_s4 + $0x330] sm:$0xff] }
  0x38   :  { %4716 = vst [vmem:[#allocation63_spill] sm:$0xff] %v2747_v15  ;;  %v2772_v15 = vld [vmem:[%s4657_s4 + $0x338] sm:$0xff] }
  0x39   :  { %4717 = vst [vmem:[#allocation64_spill] sm:$0xff] %v2752_v13  ;;  %v2777_v13 = vld [vmem:[%s4657_s4 + $0x340] sm:$0xff] }
  0x3a   :  { %4718 = vst [vmem:[#allocation65_spill] sm:$0xff] %v2757_v11  ;;  %v2862_v11 = vld [vmem:[%s4657_s4 + $0x3c8] sm:$0xff] }
  0x3b   :  { %4719 = vst [vmem:[#allocation66_spill] sm:$0xff] %v2762_v54  ;;  %v2787_v54 = vld [vmem:[%s4657_s4 + $0x350] sm:$0xff] }
  0x3c   :  { %4720 = vst [vmem:[#allocation67_spill] sm:$0xff] %v2767_v50  ;;  %v2792_v50 = vld [vmem:[%s4657_s4 + $0x358] sm:$0xff] }
  0x3d   :  { %4721 = vst [vmem:[#allocation68_spill] sm:$0xff] %v2772_v15  ;;  %v2797_v15 = vld [vmem:[%s4657_s4 + $0x360] sm:$0xff] }
  0x3e   :  { %4722 = vst [vmem:[#allocation69_spill] sm:$0xff] %v2777_v13 }
  0x3f   :  { %4723 = vst [vmem:[#allocation70_spill] sm:$0xff] %v2782_v9  ;;  %v2807_v9 = vld [vmem:[%s4657_s4 + $0x370] sm:$0xff] }
  0x40   :  { %4724 = vst [vmem:[#allocation71_spill] sm:$0xff] %v2787_v54  ;;  %v2812_v54 = vld [vmem:[%s4657_s4 + $0x378] sm:$0xff] }
  0x41   :  { %4725 = vst [vmem:[#allocation72_spill] sm:$0xff] %v2792_v50  ;;  %v2817_v50 = vld [vmem:[%s4657_s4 + $0x380] sm:$0xff] }
  0x42   :  { %4726 = vst [vmem:[#allocation73_spill] sm:$0xff] %v2797_v15 }
  0x43   :  { %4727 = vst [vmem:[#allocation74_spill] sm:$0xff] %v2802_v19  ;;  %v2827_v19 = vld [vmem:[%s4657_s4 + $0x390] sm:$0xff] }
  0x44   :  { %4728 = vst [vmem:[#allocation75_spill] sm:$0xff] %v2807_v9  ;;  %v2832_v9 = vld [vmem:[%s4657_s4 + $0x398] sm:$0xff] }
  0x45   :  { %4729 = vst [vmem:[#allocation76_spill] sm:$0xff] %v2812_v54  ;;  %v2837_v54 = vld [vmem:[%s4657_s4 + $0x3a0] sm:$0xff] }
  0x46   :  { %4730 = vst [vmem:[#allocation77_spill] sm:$0xff] %v2817_v50 }
  0x47   :  { %4731 = vst [vmem:[#allocation78_spill] sm:$0xff] %v2822_v17  ;;  %v2847_v17 = vld [vmem:[%s4657_s4 + $0x3b0] sm:$0xff] }
  0x48   :  { %4732 = vst [vmem:[#allocation79_spill] sm:$0xff] %v2827_v19  ;;  %v2852_v19 = vld [vmem:[%s4657_s4 + $0x3b8] sm:$0xff] }
  0x49   :  { %4733 = vst [vmem:[#allocation80_spill] sm:$0xff] %v2832_v9  ;;  %v2857_v9 = vld [vmem:[%s4657_s4 + $0x3c0] sm:$0xff] }
  0x4a   :  { %4734 = vst [vmem:[#allocation81_spill] sm:$0xff] %v2842_v58  ;;  %v2867_v58 = vld [vmem:[%s4657_s4 + $0x3d0] sm:$0xff] }
  0x4b   :  { %4735 = vst [vmem:[#allocation82_spill] sm:$0xff] %v2847_v17  ;;  %v2872_v17 = vld [vmem:[%s4657_s4 + $0x3d8] sm:$0xff] }
  0x4c   :  { %4736 = vst [vmem:[#allocation83_spill] sm:$0xff] %v2852_v19  ;;  %v2877_v19 = vld [vmem:[%s4657_s4 + $0x3e0] sm:$0xff] }
  0x4d   :  { %4737 = vst [vmem:[#allocation84_spill] sm:$0xff] %v2857_v9  ;;  %v2882_v9 = vld [vmem:[%s4657_s4 + $0x3e8] sm:$0xff] }
  0x4e   :  { %4738 = vst [vmem:[#allocation85_spill] sm:$0xff] %v2862_v11  ;;  %v2887_v11 = vld [vmem:[%s4657_s4 + $0x3f0] sm:$0xff] }
  0x4f   :  { %4739 = vst [vmem:[#allocation86_spill] sm:$0xff] %v2867_v58  ;;  %v2892_v58 = vld [vmem:[%s4657_s4 + $0x3f8] sm:$0xff] }
  0x50   :  { %4740 = vst [vmem:[#allocation87_spill] sm:$0xff] %v2872_v17  ;;  %v2897_v17 = vld [vmem:[%s4657_s4 + $0x400] sm:$0xff] }
  0x51   :  { %4741 = vst [vmem:[#allocation88_spill] sm:$0xff] %v2877_v19  ;;  %v2902_v19 = vld [vmem:[%s4657_s4 + $0x408] sm:$0xff] }
  0x52   :  { %4742 = vst [vmem:[#allocation89_spill] sm:$0xff] %v2882_v9  ;;  %v2907_v9 = vld [vmem:[%s4657_s4 + $0x410] sm:$0xff] }
  0x53   :  { %4743 = vst [vmem:[#allocation90_spill] sm:$0xff] %v2887_v11  ;;  %v2912_v11 = vld [vmem:[%s4657_s4 + $0x418] sm:$0xff] }
  0x54   :  { %4744 = vst [vmem:[#allocation91_spill] sm:$0xff] %v2892_v58  ;;  %v2917_v58 = vld [vmem:[%s4657_s4 + $0x420] sm:$0xff] }
  0x55   :  { %4745 = vst [vmem:[#allocation92_spill] sm:$0xff] %v2897_v17  ;;  %v2922_v17 = vld [vmem:[%s4657_s4 + $0x428] sm:$0xff] }
  0x56   :  { %4746 = vst [vmem:[#allocation93_spill] sm:$0xff] %v2902_v19  ;;  %v2927_v19 = vld [vmem:[%s4657_s4 + $0x430] sm:$0xff] }
  0x57   :  { %4747 = vst [vmem:[#allocation94_spill] sm:$0xff] %v2907_v9  ;;  %v2932_v9 = vld [vmem:[%s4657_s4 + $0x438] sm:$0xff] }
  0x58   :  { %4748 = vst [vmem:[#allocation95_spill] sm:$0xff] %v2912_v11  ;;  %v2937_v11 = vld [vmem:[%s4657_s4 + $0x440] sm:$0xff] }
  0x59   :  { %4749 = vst [vmem:[#allocation96_spill] sm:$0xff] %v2917_v58  ;;  %v2942_v58 = vld [vmem:[%s4657_s4 + $0x448] sm:$0xff] }
  0x5a   :  { %4750 = vst [vmem:[#allocation97_spill] sm:$0xff] %v2922_v17  ;;  %v2947_v17 = vld [vmem:[%s4657_s4 + $0x450] sm:$0xff] }
  0x5b   :  { %4751 = vst [vmem:[#allocation98_spill] sm:$0xff] %v2927_v19  ;;  %v2952_v19 = vld [vmem:[%s4657_s4 + $0x458] sm:$0xff] }
  0x5c   :  { %4752 = vst [vmem:[#allocation99_spill] sm:$0xff] %v2932_v9  ;;  %v2957_v9 = vld [vmem:[%s4657_s4 + $0x460] sm:$0xff] }
  0x5d   :  { %4753 = vst [vmem:[#allocation100_spill] sm:$0xff] %v2937_v11  ;;  %v2962_v11 = vld [vmem:[%s4657_s4 + $0x468] sm:$0xff] }
  0x5e   :  { %4754 = vst [vmem:[#allocation101_spill] sm:$0xff] %v2942_v58  ;;  %v2967_v58 = vld [vmem:[%s4657_s4 + $0x470] sm:$0xff] }
  0x5f   :  { %4755 = vst [vmem:[#allocation102_spill] sm:$0xff] %v2947_v17  ;;  %v2972_v17 = vld [vmem:[%s4657_s4 + $0x478] sm:$0xff] }
  0x60   :  { %4756 = vst [vmem:[#allocation103_spill] sm:$0xff] %v2952_v19  ;;  %v2977_v19 = vld [vmem:[%s4657_s4 + $0x480] sm:$0xff] }
  0x61   :  { %4757 = vst [vmem:[#allocation104_spill] sm:$0xff] %v2957_v9  ;;  %v2982_v9 = vld [vmem:[%s4657_s4 + $0x488] sm:$0xff] }
  0x62   :  { %4758 = vst [vmem:[#allocation105_spill] sm:$0xff] %v2962_v11  ;;  %v2987_v11 = vld [vmem:[%s4657_s4 + $0x490] sm:$0xff] }
  0x63   :  { %4759 = vst [vmem:[#allocation106_spill] sm:$0xff] %v2967_v58  ;;  %v2992_v58 = vld [vmem:[%s4657_s4 + $0x498] sm:$0xff] }
  0x64   :  { %4760 = vst [vmem:[#allocation107_spill] sm:$0xff] %v2972_v17  ;;  %v2997_v17 = vld [vmem:[%s4657_s4 + $0x4a0] sm:$0xff] }
  0x65   :  { %4761 = vst [vmem:[#allocation108_spill] sm:$0xff] %v2977_v19  ;;  %v3002_v19 = vld [vmem:[%s4657_s4 + $0x4a8] sm:$0xff] }
  0x66   :  { %4762 = vst [vmem:[#allocation109_spill] sm:$0xff] %v2982_v9  ;;  %v3007_v9 = vld [vmem:[%s4657_s4 + $0x4b0] sm:$0xff] }
  0x67   :  { %4763 = vst [vmem:[#allocation110_spill] sm:$0xff] %v2987_v11  ;;  %v3012_v11 = vld [vmem:[%s4657_s4 + $0x4b8] sm:$0xff] }
  0x68   :  { %4764 = vst [vmem:[#allocation111_spill] sm:$0xff] %v2992_v58  ;;  %v3017_v58 = vld [vmem:[%s4657_s4 + $0x4c0] sm:$0xff] }
  0x69   :  { %4765 = vst [vmem:[#allocation112_spill] sm:$0xff] %v2997_v17  ;;  %v3022_v17 = vld [vmem:[%s4657_s4 + $0x4c8] sm:$0xff] }
  0x6a   :  { %4766 = vst [vmem:[#allocation113_spill] sm:$0xff] %v3002_v19  ;;  %v3027_v19 = vld [vmem:[%s4657_s4 + $0x4d0] sm:$0xff] }
  0x6b   :  { %4767 = vst [vmem:[#allocation114_spill] sm:$0xff] %v3007_v9  ;;  %v3032_v9 = vld [vmem:[%s4657_s4 + $0x4d8] sm:$0xff] }
  0x6c   :  { %4768 = vst [vmem:[#allocation115_spill] sm:$0xff] %v3012_v11  ;;  %v3037_v11 = vld [vmem:[%s4657_s4 + $0x4e0] sm:$0xff] }
  0x6d   :  { %4769 = vst [vmem:[#allocation116_spill] sm:$0xff] %v3017_v58  ;;  %v3042_v58 = vld [vmem:[%s4657_s4 + $0x4e8] sm:$0xff] }
  0x6e   :  { %4770 = vst [vmem:[#allocation117_spill] sm:$0xff] %v3022_v17  ;;  %v3047_v17 = vld [vmem:[%s4657_s4 + $0x4f0] sm:$0xff] }
  0x6f   :  { %4771 = vst [vmem:[#allocation118_spill] sm:$0xff] %v3027_v19  ;;  %v3052_v19 = vld [vmem:[%s4657_s4 + $0x4f8] sm:$0xff] }
  0x70   :  { %4772 = vst [vmem:[#allocation119_spill] sm:$0xff] %v3032_v9  ;;  %v3057_v9 = vld [vmem:[%s4657_s4 + $0x500] sm:$0xff] }
  0x71   :  { %4773 = vst [vmem:[#allocation120_spill] sm:$0xff] %v3037_v11  ;;  %v3062_v11 = vld [vmem:[%s4657_s4 + $0x508] sm:$0xff] }
  0x72   :  { %4774 = vst [vmem:[#allocation121_spill] sm:$0xff] %v3042_v58  ;;  %v3067_v58 = vld [vmem:[%s4657_s4 + $0x510] sm:$0xff] }
  0x73   :  { %4775 = vst [vmem:[#allocation122_spill] sm:$0xff] %v3047_v17  ;;  %v3072_v17 = vld [vmem:[%s4657_s4 + $0x518] sm:$0xff] }
  0x74   :  { %4776 = vst [vmem:[#allocation123_spill] sm:$0xff] %v3052_v19  ;;  %v3077_v19 = vld [vmem:[%s4657_s4 + $0x520] sm:$0xff] }
  0x75   :  { %4777 = vst [vmem:[#allocation124_spill] sm:$0xff] %v3057_v9  ;;  %v3082_v9 = vld [vmem:[%s4657_s4 + $0x528] sm:$0xff] }
  0x76   :  { %4778 = vst [vmem:[#allocation125_spill] sm:$0xff] %v3062_v11  ;;  %v3087_v11 = vld [vmem:[%s4657_s4 + $0x530] sm:$0xff] }
  0x77   :  { %4779 = vst [vmem:[#allocation126_spill] sm:$0xff] %v3067_v58  ;;  %v3092_v58 = vld [vmem:[%s4657_s4 + $0x538] sm:$0xff] }
  0x78   :  { %4780 = vst [vmem:[#allocation127_spill] sm:$0xff] %v3072_v17  ;;  %v3097_v17 = vld [vmem:[%s4657_s4 + $0x540] sm:$0xff] }
  0x79   :  { %4781 = vst [vmem:[#allocation128_spill] sm:$0xff] %v3077_v19  ;;  %v3102_v19 = vld [vmem:[%s4657_s4 + $0x548] sm:$0xff] }
  0x7a   :  { %4782 = vst [vmem:[#allocation129_spill] sm:$0xff] %v3082_v9  ;;  %v3107_v9 = vld [vmem:[%s4657_s4 + $0x550] sm:$0xff] }
  0x7b   :  { %4783 = vst [vmem:[#allocation130_spill] sm:$0xff] %v3087_v11  ;;  %v3112_v11 = vld [vmem:[%s4657_s4 + $0x558] sm:$0xff] }
  0x7c   :  { %4784 = vst [vmem:[#allocation131_spill] sm:$0xff] %v3092_v58  ;;  %v3117_v58 = vld [vmem:[%s4657_s4 + $0x560] sm:$0xff] }
  0x7d   :  { %4785 = vst [vmem:[#allocation132_spill] sm:$0xff] %v3097_v17  ;;  %v3122_v17 = vld [vmem:[%s4657_s4 + $0x568] sm:$0xff] }
  0x7e   :  { %4786 = vst [vmem:[#allocation133_spill] sm:$0xff] %v3102_v19  ;;  %v3127_v19 = vld [vmem:[%s4657_s4 + $0x570] sm:$0xff] }
  0x7f   :  { %4787 = vst [vmem:[#allocation134_spill] sm:$0xff] %v3107_v9  ;;  %v3132_v9 = vld [vmem:[%s4657_s4 + $0x578] sm:$0xff] }
  0x80   :  { %4788 = vst [vmem:[#allocation135_spill] sm:$0xff] %v3112_v11  ;;  %v3137_v11 = vld [vmem:[%s4657_s4 + $0x580] sm:$0xff] }
  0x81   :  { %4789 = vst [vmem:[#allocation136_spill] sm:$0xff] %v3117_v58  ;;  %v3142_v58 = vld [vmem:[%s4657_s4 + $0x588] sm:$0xff] }
  0x82   :  { %4790 = vst [vmem:[#allocation137_spill] sm:$0xff] %v3122_v17  ;;  %v3147_v17 = vld [vmem:[%s4657_s4 + $0x590] sm:$0xff] }
  0x83   :  { %4791 = vst [vmem:[#allocation138_spill] sm:$0xff] %v3127_v19  ;;  %v3152_v19 = vld [vmem:[%s4657_s4 + $0x598] sm:$0xff] }
  0x84   :  { %4792 = vst [vmem:[#allocation139_spill] sm:$0xff] %v3132_v9  ;;  %v3157_v9 = vld [vmem:[%s4657_s4 + $0x5a0] sm:$0xff] }
  0x85   :  { %4793 = vst [vmem:[#allocation140_spill] sm:$0xff] %v3137_v11  ;;  %v3162_v11 = vld [vmem:[%s4657_s4 + $0x5a8] sm:$0xff] }
  0x86   :  { %4794 = vst [vmem:[#allocation141_spill] sm:$0xff] %v3142_v58  ;;  %v3167_v58 = vld [vmem:[%s4657_s4 + $0x5b0] sm:$0xff] }
  0x87   :  { %4795 = vst [vmem:[#allocation142_spill] sm:$0xff] %v3147_v17  ;;  %v3172_v17 = vld [vmem:[%s4657_s4 + $0x5b8] sm:$0xff] }
  0x88   :  { %4796 = vst [vmem:[#allocation143_spill] sm:$0xff] %v3152_v19  ;;  %v3177_v19 = vld [vmem:[%s4657_s4 + $0x5c0] sm:$0xff] }
  0x89   :  { %4797 = vst [vmem:[#allocation144_spill] sm:$0xff] %v3157_v9  ;;  %v3182_v9 = vld [vmem:[%s4657_s4 + $0x5c8] sm:$0xff] }
  0x8a   :  { %4798 = vst [vmem:[#allocation145_spill] sm:$0xff] %v3162_v11  ;;  %v3187_v11 = vld [vmem:[%s4657_s4 + $0x5d0] sm:$0xff] }
  0x8b   :  { %4799 = vst [vmem:[#allocation146_spill] sm:$0xff] %v3167_v58  ;;  %v3192_v58 = vld [vmem:[%s4657_s4 + $0x5d8] sm:$0xff] }
  0x8c   :  { %4800 = vst [vmem:[#allocation147_spill] sm:$0xff] %v3172_v17  ;;  %v3197_v17 = vld [vmem:[%s4657_s4 + $0x5e0] sm:$0xff] }
  0x8d   :  { %4801 = vst [vmem:[#allocation148_spill] sm:$0xff] %v3177_v19  ;;  %v3202_v19 = vld [vmem:[%s4657_s4 + $0x5e8] sm:$0xff] }
  0x8e   :  { %4802 = vst [vmem:[#allocation149_spill] sm:$0xff] %v3182_v9  ;;  %v3207_v9 = vld [vmem:[%s4657_s4 + $0x5f0] sm:$0xff] }
  0x8f   :  { %4803 = vst [vmem:[#allocation150_spill] sm:$0xff] %v3187_v11  ;;  %v3212_v11 = vld [vmem:[%s4657_s4 + $0x5f8] sm:$0xff] }
  0x90   :  { %4804 = vst [vmem:[#allocation151_spill] sm:$0xff] %v3192_v58  ;;  %v3217_v58 = vld [vmem:[%s4657_s4 + $0x600] sm:$0xff] }
  0x91   :  { %4805 = vst [vmem:[#allocation152_spill] sm:$0xff] %v3197_v17  ;;  %v3222_v17 = vld [vmem:[%s4657_s4 + $0x608] sm:$0xff] }
  0x92   :  { %4806 = vst [vmem:[#allocation153_spill] sm:$0xff] %v3202_v19  ;;  %v3227_v19 = vld [vmem:[%s4657_s4 + $0x610] sm:$0xff] }
  0x93   :  { %4807 = vst [vmem:[#allocation154_spill] sm:$0xff] %v3207_v9  ;;  %v3232_v9 = vld [vmem:[%s4657_s4 + $0x618] sm:$0xff] }
  0x94   :  { %4808 = vst [vmem:[#allocation155_spill] sm:$0xff] %v3212_v11  ;;  %v3237_v11 = vld [vmem:[%s4657_s4 + $0x620] sm:$0xff] }
  0x95   :  { %4809 = vst [vmem:[#allocation156_spill] sm:$0xff] %v3217_v58  ;;  %v3242_v58 = vld [vmem:[%s4657_s4 + $0x628] sm:$0xff] }
  0x96   :  { %4810 = vst [vmem:[#allocation157_spill] sm:$0xff] %v3222_v17  ;;  %v3247_v17 = vld [vmem:[%s4657_s4 + $0x630] sm:$0xff] }
  0x97   :  { %4811 = vst [vmem:[#allocation158_spill] sm:$0xff] %v3227_v19  ;;  %v3252_v19 = vld [vmem:[%s4657_s4 + $0x638] sm:$0xff] }
  0x98   :  { %4812 = vst [vmem:[#allocation159_spill] sm:$0xff] %v3232_v9  ;;  %v3257_v9 = vld [vmem:[%s4657_s4 + $0x640] sm:$0xff] }
  0x99   :  { %4813 = vst [vmem:[#allocation160_spill] sm:$0xff] %v3237_v11  ;;  %v3262_v11 = vld [vmem:[%s4657_s4 + $0x648] sm:$0xff] }
  0x9a   :  { %4814 = vst [vmem:[#allocation161_spill] sm:$0xff] %v3242_v58  ;;  %v3267_v58 = vld [vmem:[%s4657_s4 + $0x650] sm:$0xff] }
  0x9b   :  { %4815 = vst [vmem:[#allocation162_spill] sm:$0xff] %v3247_v17  ;;  %v3272_v17 = vld [vmem:[%s4657_s4 + $0x658] sm:$0xff] }
  0x9c   :  { %4816 = vst [vmem:[#allocation163_spill] sm:$0xff] %v3252_v19  ;;  %v3277_v19 = vld [vmem:[%s4657_s4 + $0x660] sm:$0xff] }
  0x9d   :  { %4817 = vst [vmem:[#allocation164_spill] sm:$0xff] %v3257_v9  ;;  %v3282_v9 = vld [vmem:[%s4657_s4 + $0x668] sm:$0xff] }
  0x9e   :  { %4818 = vst [vmem:[#allocation165_spill] sm:$0xff] %v3262_v11  ;;  %v3287_v11 = vld [vmem:[%s4657_s4 + $0x670] sm:$0xff] }
  0x9f   :  { %4819 = vst [vmem:[#allocation166_spill] sm:$0xff] %v3267_v58  ;;  %v3292_v58 = vld [vmem:[%s4657_s4 + $0x678] sm:$0xff] }
  0xa0   :  { %4820 = vst [vmem:[#allocation167_spill] sm:$0xff] %v3272_v17  ;;  %v3297_v17 = vld [vmem:[%s4657_s4 + $0x680] sm:$0xff] }
  0xa1   :  { %4821 = vst [vmem:[#allocation168_spill] sm:$0xff] %v3277_v19  ;;  %v3302_v19 = vld [vmem:[%s4657_s4 + $0x688] sm:$0xff] }
  0xa2   :  { %4822 = vst [vmem:[#allocation169_spill] sm:$0xff] %v3282_v9  ;;  %v3307_v9 = vld [vmem:[%s4657_s4 + $0x690] sm:$0xff] }
  0xa3   :  { %4823 = vst [vmem:[#allocation170_spill] sm:$0xff] %v3287_v11  ;;  %v3312_v11 = vld [vmem:[%s4657_s4 + $0x698] sm:$0xff] }
  0xa4   :  { %4824 = vst [vmem:[#allocation171_spill] sm:$0xff] %v3292_v58  ;;  %v3317_v58 = vld [vmem:[%s4657_s4 + $0x6a0] sm:$0xff] }
  0xa5   :  { %4825 = vst [vmem:[#allocation172_spill] sm:$0xff] %v3297_v17  ;;  %v3322_v17 = vld [vmem:[%s4657_s4 + $0x6a8] sm:$0xff] }
  0xa6   :  { %4826 = vst [vmem:[#allocation173_spill] sm:$0xff] %v3302_v19  ;;  %v3327_v19 = vld [vmem:[%s4657_s4 + $0x6b0] sm:$0xff] }
  0xa7   :  { %4827 = vst [vmem:[#allocation174_spill] sm:$0xff] %v3307_v9  ;;  %v3332_v9 = vld [vmem:[%s4657_s4 + $0x6b8] sm:$0xff] }
  0xa8   :  { %4828 = vst [vmem:[#allocation175_spill] sm:$0xff] %v3312_v11  ;;  %v3337_v11 = vld [vmem:[%s4657_s4 + $0x6c0] sm:$0xff] }
  0xa9   :  { %4829 = vst [vmem:[#allocation176_spill] sm:$0xff] %v3317_v58  ;;  %v3342_v58 = vld [vmem:[%s4657_s4 + $0x6c8] sm:$0xff] }
  0xaa   :  { %4830 = vst [vmem:[#allocation177_spill] sm:$0xff] %v3322_v17  ;;  %v3347_v17 = vld [vmem:[%s4657_s4 + $0x6d0] sm:$0xff] }
  0xab   :  { %4831 = vst [vmem:[#allocation178_spill] sm:$0xff] %v3327_v19  ;;  %v3352_v19 = vld [vmem:[%s4657_s4 + $0x6d8] sm:$0xff] }
  0xac   :  { %4832 = vst [vmem:[#allocation179_spill] sm:$0xff] %v3332_v9  ;;  %v3357_v9 = vld [vmem:[%s4657_s4 + $0x6e0] sm:$0xff] }
  0xad   :  { %4833 = vst [vmem:[#allocation180_spill] sm:$0xff] %v3337_v11  ;;  %v3362_v11 = vld [vmem:[%s4657_s4 + $0x6e8] sm:$0xff] }
  0xae   :  { %4834 = vst [vmem:[#allocation181_spill] sm:$0xff] %v3342_v58  ;;  %v3367_v58 = vld [vmem:[%s4657_s4 + $0x6f0] sm:$0xff] }
  0xaf   :  { %4835 = vst [vmem:[#allocation182_spill] sm:$0xff] %v3347_v17  ;;  %v3372_v17 = vld [vmem:[%s4657_s4 + $0x6f8] sm:$0xff] }
  0xb0   :  { %4836 = vst [vmem:[#allocation183_spill] sm:$0xff] %v3352_v19  ;;  %v3377_v19 = vld [vmem:[%s4657_s4 + $0x700] sm:$0xff] }
  0xb1   :  { %4837 = vst [vmem:[#allocation184_spill] sm:$0xff] %v3357_v9  ;;  %v3382_v9 = vld [vmem:[%s4657_s4 + $0x708] sm:$0xff] }
  0xb2   :  { %4838 = vst [vmem:[#allocation185_spill] sm:$0xff] %v3362_v11  ;;  %v3387_v11 = vld [vmem:[%s4657_s4 + $0x710] sm:$0xff] }
  0xb3   :  { %4839 = vst [vmem:[#allocation186_spill] sm:$0xff] %v3367_v58  ;;  %v3392_v58 = vld [vmem:[%s4657_s4 + $0x718] sm:$0xff] }
  0xb4   :  { %4840 = vst [vmem:[#allocation187_spill] sm:$0xff] %v3372_v17  ;;  %v3397_v17 = vld [vmem:[%s4657_s4 + $0x720] sm:$0xff] }
  0xb5   :  { %4841 = vst [vmem:[#allocation188_spill] sm:$0xff] %v3377_v19  ;;  %v3402_v19 = vld [vmem:[%s4657_s4 + $0x728] sm:$0xff] }
  0xb6   :  { %4842 = vst [vmem:[#allocation189_spill] sm:$0xff] %v3382_v9  ;;  %v3407_v9 = vld [vmem:[%s4657_s4 + $0x730] sm:$0xff] }
  0xb7   :  { %4843 = vst [vmem:[#allocation190_spill] sm:$0xff] %v3387_v11  ;;  %v3412_v11 = vld [vmem:[%s4657_s4 + $0x738] sm:$0xff] }
  0xb8   :  { %4844 = vst [vmem:[#allocation191_spill] sm:$0xff] %v3392_v58  ;;  %v3417_v58 = vld [vmem:[%s4657_s4 + $0x740] sm:$0xff] }
  0xb9   :  { %4845 = vst [vmem:[#allocation192_spill] sm:$0xff] %v3397_v17  ;;  %v3422_v17 = vld [vmem:[%s4657_s4 + $0x748] sm:$0xff] }
  0xba   :  { %4846 = vst [vmem:[#allocation193_spill] sm:$0xff] %v3402_v19  ;;  %v3427_v19 = vld [vmem:[%s4657_s4 + $0x750] sm:$0xff] }
  0xbb   :  { %4847 = vst [vmem:[#allocation194_spill] sm:$0xff] %v3407_v9  ;;  %v3432_v9 = vld [vmem:[%s4657_s4 + $0x758] sm:$0xff] }
  0xbc   :  { %4848 = vst [vmem:[#allocation195_spill] sm:$0xff] %v3412_v11  ;;  %v3437_v11 = vld [vmem:[%s4657_s4 + $0x760] sm:$0xff] }
  0xbd   :  { %4849 = vst [vmem:[#allocation196_spill] sm:$0xff] %v3417_v58  ;;  %v3442_v58 = vld [vmem:[%s4657_s4 + $0x768] sm:$0xff] }
  0xbe   :  { %4850 = vst [vmem:[#allocation197_spill] sm:$0xff] %v3422_v17  ;;  %v3447_v17 = vld [vmem:[%s4657_s4 + $0x770] sm:$0xff] }
  0xbf   :  { %4851 = vst [vmem:[#allocation198_spill] sm:$0xff] %v3427_v19  ;;  %v3452_v19 = vld [vmem:[%s4657_s4 + $0x778] sm:$0xff] }
  0xc0   :  { %4852 = vst [vmem:[#allocation199_spill] sm:$0xff] %v3432_v9  ;;  %v3457_v9 = vld [vmem:[%s4657_s4 + $0x780] sm:$0xff] }
  0xc1   :  { %4853 = vst [vmem:[#allocation200_spill] sm:$0xff] %v3437_v11  ;;  %v3462_v11 = vld [vmem:[%s4657_s4 + $0x788] sm:$0xff] }
  0xc2   :  { %4854 = vst [vmem:[#allocation201_spill] sm:$0xff] %v3442_v58  ;;  %v3467_v58 = vld [vmem:[%s4657_s4 + $0x790] sm:$0xff] }
  0xc3   :  { %4855 = vst [vmem:[#allocation202_spill] sm:$0xff] %v3447_v17  ;;  %v3472_v17 = vld [vmem:[%s4657_s4 + $0x798] sm:$0xff] }
  0xc4   :  { %4856 = vst [vmem:[#allocation203_spill] sm:$0xff] %v3452_v19  ;;  %v3477_v19 = vld [vmem:[%s4657_s4 + $0x7a0] sm:$0xff] }
  0xc5   :  { %4857 = vst [vmem:[#allocation204_spill] sm:$0xff] %v3457_v9  ;;  %v3482_v9 = vld [vmem:[%s4657_s4 + $0x7a8] sm:$0xff] }
  0xc6   :  { %4858 = vst [vmem:[#allocation205_spill] sm:$0xff] %v3462_v11  ;;  %v3487_v11 = vld [vmem:[%s4657_s4 + $0x7b0] sm:$0xff] }
  0xc7   :  { %4859 = vst [vmem:[#allocation206_spill] sm:$0xff] %v3467_v58  ;;  %v3492_v58 = vld [vmem:[%s4657_s4 + $0x7b8] sm:$0xff] }
  0xc8   :  { %4860 = vst [vmem:[#allocation207_spill] sm:$0xff] %v3472_v17  ;;  %v3497_v17 = vld [vmem:[%s4657_s4 + $0x7c0] sm:$0xff] }
  0xc9   :  { %4861 = vst [vmem:[#allocation208_spill] sm:$0xff] %v3477_v19  ;;  %v3502_v19 = vld [vmem:[%s4657_s4 + $0x7c8] sm:$0xff] }
  0xca   :  { %4862 = vst [vmem:[#allocation209_spill] sm:$0xff] %v3482_v9  ;;  %v3507_v9 = vld [vmem:[%s4657_s4 + $0x7d0] sm:$0xff] }
  0xcb   :  { %4863 = vst [vmem:[#allocation210_spill] sm:$0xff] %v3487_v11  ;;  %v3512_v11 = vld [vmem:[%s4657_s4 + $0x7d8] sm:$0xff] }
  0xcc   :  { %4864 = vst [vmem:[#allocation211_spill] sm:$0xff] %v3492_v58  ;;  %v3517_v58 = vld [vmem:[%s4657_s4 + $0x7e0] sm:$0xff] }
  0xcd   :  { %4865 = vst [vmem:[#allocation212_spill] sm:$0xff] %v3497_v17  ;;  %v3522_v17 = vld [vmem:[%s4657_s4 + $0x7e8] sm:$0xff] }
  0xce   :  { %4866 = vst [vmem:[#allocation213_spill] sm:$0xff] %v3502_v19  ;;  %v3527_v19 = vld [vmem:[%s4657_s4 + $0x7f0] sm:$0xff] }
  0xcf   :  { %4867 = vst [vmem:[#allocation214_spill] sm:$0xff] %v3507_v9  ;;  %v3532_v9 = vld [vmem:[%s4657_s4 + $0x7f8] sm:$0xff] }
  0xd0   :  { %4868 = vst [vmem:[#allocation215_spill] sm:$0xff] %v3512_v11  ;;  %v3537_v11 = vld [vmem:[%s4657_s4 + $0x800] sm:$0xff] }
  0xd1   :  { %4869 = vst [vmem:[#allocation216_spill] sm:$0xff] %v3517_v58  ;;  %v3542_v58 = vld [vmem:[%s4657_s4 + $0x808] sm:$0xff] }
  0xd2   :  { %4870 = vst [vmem:[#allocation217_spill] sm:$0xff] %v3522_v17  ;;  %v3547_v17 = vld [vmem:[%s4657_s4 + $0x810] sm:$0xff] }
  0xd3   :  { %4871 = vst [vmem:[#allocation218_spill] sm:$0xff] %v3527_v19  ;;  %v3552_v19 = vld [vmem:[%s4657_s4 + $0x818] sm:$0xff] }
  0xd4   :  { %4872 = vst [vmem:[#allocation219_spill] sm:$0xff] %v3532_v9  ;;  %v3557_v9 = vld [vmem:[%s4657_s4 + $0x820] sm:$0xff] }
  0xd5   :  { %4873 = vst [vmem:[#allocation220_spill] sm:$0xff] %v3537_v11  ;;  %v3562_v11 = vld [vmem:[%s4657_s4 + $0x828] sm:$0xff] }
  0xd6   :  { %4874 = vst [vmem:[#allocation221_spill] sm:$0xff] %v3542_v58  ;;  %v3567_v58 = vld [vmem:[%s4657_s4 + $0x830] sm:$0xff] }
  0xd7   :  { %4875 = vst [vmem:[#allocation222_spill] sm:$0xff] %v3547_v17  ;;  %v3572_v17 = vld [vmem:[%s4657_s4 + $0x838] sm:$0xff] }
  0xd8   :  { %4876 = vst [vmem:[#allocation223_spill] sm:$0xff] %v3552_v19  ;;  %v3577_v19 = vld [vmem:[%s4657_s4 + $0x840] sm:$0xff] }
  0xd9   :  { %4877 = vst [vmem:[#allocation224_spill] sm:$0xff] %v3557_v9  ;;  %v3582_v9 = vld [vmem:[%s4657_s4 + $0x848] sm:$0xff] }
  0xda   :  { %4878 = vst [vmem:[#allocation225_spill] sm:$0xff] %v3562_v11  ;;  %v3587_v11 = vld [vmem:[%s4657_s4 + $0x850] sm:$0xff] }
  0xdb   :  { %4879 = vst [vmem:[#allocation226_spill] sm:$0xff] %v3567_v58  ;;  %v3592_v58 = vld [vmem:[%s4657_s4 + $0x858] sm:$0xff] }
  0xdc   :  { %4880 = vst [vmem:[#allocation227_spill] sm:$0xff] %v3572_v17  ;;  %v3597_v17 = vld [vmem:[%s4657_s4 + $0x860] sm:$0xff] }
  0xdd   :  { %4881 = vst [vmem:[#allocation228_spill] sm:$0xff] %v3577_v19  ;;  %v3602_v19 = vld [vmem:[%s4657_s4 + $0x868] sm:$0xff] }
  0xde   :  { %4882 = vst [vmem:[#allocation229_spill] sm:$0xff] %v3582_v9  ;;  %v3607_v9 = vld [vmem:[%s4657_s4 + $0x870] sm:$0xff] }
  0xdf   :  { %4883 = vst [vmem:[#allocation230_spill] sm:$0xff] %v3587_v11  ;;  %v3612_v11 = vld [vmem:[%s4657_s4 + $0x878] sm:$0xff] }
  0xe0   :  { %4884 = vst [vmem:[#allocation231_spill] sm:$0xff] %v3592_v58  ;;  %v3617_v58 = vld [vmem:[%s4657_s4 + $0x880] sm:$0xff] }
  0xe1   :  { %4885 = vst [vmem:[#allocation232_spill] sm:$0xff] %v3597_v17  ;;  %v3622_v17 = vld [vmem:[%s4657_s4 + $0x888] sm:$0xff] }
  0xe2   :  { %4886 = vst [vmem:[#allocation233_spill] sm:$0xff] %v3602_v19  ;;  %v3627_v19 = vld [vmem:[%s4657_s4 + $0x890] sm:$0xff] }
  0xe3   :  { %4887 = vst [vmem:[#allocation234_spill] sm:$0xff] %v3607_v9  ;;  %v3632_v9 = vld [vmem:[%s4657_s4 + $0x898] sm:$0xff] }
  0xe4   :  { %4888 = vst [vmem:[#allocation235_spill] sm:$0xff] %v3612_v11  ;;  %v3637_v11 = vld [vmem:[%s4657_s4 + $0x8a0] sm:$0xff] }
  0xe5   :  { %4889 = vst [vmem:[#allocation236_spill] sm:$0xff] %v3617_v58  ;;  %v3642_v58 = vld [vmem:[%s4657_s4 + $0x8a8] sm:$0xff] }
  0xe6   :  { %4890 = vst [vmem:[#allocation237_spill] sm:$0xff] %v3622_v17  ;;  %v3647_v17 = vld [vmem:[%s4657_s4 + $0x8b0] sm:$0xff] }
  0xe7   :  { %4891 = vst [vmem:[#allocation238_spill] sm:$0xff] %v3627_v19  ;;  %v3652_v19 = vld [vmem:[%s4657_s4 + $0x8b8] sm:$0xff] }
  0xe8   :  { %4892 = vst [vmem:[#allocation239_spill] sm:$0xff] %v3632_v9  ;;  %v3657_v9 = vld [vmem:[%s4657_s4 + $0x8c0] sm:$0xff] }
  0xe9   :  { %4893 = vst [vmem:[#allocation240_spill] sm:$0xff] %v3637_v11  ;;  %v3662_v11 = vld [vmem:[%s4657_s4 + $0x8c8] sm:$0xff] }
  0xea   :  { %4894 = vst [vmem:[#allocation241_spill] sm:$0xff] %v3642_v58  ;;  %v3667_v58 = vld [vmem:[%s4657_s4 + $0x8d0] sm:$0xff] }
  0xeb   :  { %4895 = vst [vmem:[#allocation242_spill] sm:$0xff] %v3647_v17  ;;  %v3672_v17 = vld [vmem:[%s4657_s4 + $0x8d8] sm:$0xff] }
  0xec   :  { %4896 = vst [vmem:[#allocation243_spill] sm:$0xff] %v3652_v19  ;;  %v3677_v19 = vld [vmem:[%s4657_s4 + $0x8e0] sm:$0xff] }
  0xed   :  { %4897 = vst [vmem:[#allocation244_spill] sm:$0xff] %v3657_v9  ;;  %v3682_v9 = vld [vmem:[%s4657_s4 + $0x8e8] sm:$0xff] }
  0xee   :  { %4898 = vst [vmem:[#allocation245_spill] sm:$0xff] %v3662_v11  ;;  %v3687_v11 = vld [vmem:[%s4657_s4 + $0x8f0] sm:$0xff] }
  0xef   :  { %4899 = vst [vmem:[#allocation246_spill] sm:$0xff] %v3667_v58  ;;  %v3692_v58 = vld [vmem:[%s4657_s4 + $0x8f8] sm:$0xff] }
  0xf0   :  { %4900 = vst [vmem:[#allocation247_spill] sm:$0xff] %v3672_v17  ;;  %v3697_v17 = vld [vmem:[%s4657_s4 + $0x900] sm:$0xff] }
  0xf1   :  { %4901 = vst [vmem:[#allocation248_spill] sm:$0xff] %v3677_v19  ;;  %v3702_v19 = vld [vmem:[%s4657_s4 + $0x908] sm:$0xff] }
  0xf2   :  { %4902 = vst [vmem:[#allocation249_spill] sm:$0xff] %v3682_v9  ;;  %v3707_v9 = vld [vmem:[%s4657_s4 + $0x910] sm:$0xff] }
  0xf3   :  { %4903 = vst [vmem:[#allocation250_spill] sm:$0xff] %v3687_v11  ;;  %v3712_v11 = vld [vmem:[%s4657_s4 + $0x918] sm:$0xff] }
  0xf4   :  { %4904 = vst [vmem:[#allocation251_spill] sm:$0xff] %v3692_v58  ;;  %v3717_v58 = vld [vmem:[%s4657_s4 + $0x920] sm:$0xff] }
  0xf5   :  { %4905 = vst [vmem:[#allocation252_spill] sm:$0xff] %v3697_v17  ;;  %v3722_v17 = vld [vmem:[%s4657_s4 + $0x928] sm:$0xff] }
  0xf6   :  { %4906 = vst [vmem:[#allocation253_spill] sm:$0xff] %v3702_v19  ;;  %v3727_v19 = vld [vmem:[%s4657_s4 + $0x930] sm:$0xff] }
  0xf7   :  { %4907 = vst [vmem:[#allocation254_spill] sm:$0xff] %v3707_v9  ;;  %v3732_v9 = vld [vmem:[%s4657_s4 + $0x938] sm:$0xff] }
  0xf8   :  { %4908 = vst [vmem:[#allocation255_spill] sm:$0xff] %v3712_v11  ;;  %v3737_v11 = vld [vmem:[%s4657_s4 + $0x940] sm:$0xff] }
  0xf9   :  { %4909 = vst [vmem:[#allocation256_spill] sm:$0xff] %v3717_v58  ;;  %v3742_v58 = vld [vmem:[%s4657_s4 + $0x948] sm:$0xff] }
  0xfa   :  { %4910 = vst [vmem:[#allocation257_spill] sm:$0xff] %v3722_v17  ;;  %v3747_v17 = vld [vmem:[%s4657_s4 + $0x950] sm:$0xff] }
  0xfb   :  { %4911 = vst [vmem:[#allocation258_spill] sm:$0xff] %v3727_v19  ;;  %v3752_v19 = vld [vmem:[%s4657_s4 + $0x958] sm:$0xff] }
  0xfc   :  { %4912 = vst [vmem:[#allocation259_spill] sm:$0xff] %v3732_v9  ;;  %v3757_v9 = vld [vmem:[%s4657_s4 + $0x960] sm:$0xff] }
  0xfd   :  { %4913 = vst [vmem:[#allocation260_spill] sm:$0xff] %v3737_v11  ;;  %v3762_v11 = vld [vmem:[%s4657_s4 + $0x968] sm:$0xff] }
  0xfe   :  { %4914 = vst [vmem:[#allocation261_spill] sm:$0xff] %v3742_v58  ;;  %v3767_v58 = vld [vmem:[%s4657_s4 + $0x970] sm:$0xff] }
  0xff   :  { %4915 = vst [vmem:[#allocation262_spill] sm:$0xff] %v3747_v17  ;;  %v3772_v17 = vld [vmem:[%s4657_s4 + $0x978] sm:$0xff] }
 0x100   :  { %4916 = vst [vmem:[#allocation263_spill] sm:$0xff] %v3752_v19  ;;  %v3777_v19 = vld [vmem:[%s4657_s4 + $0x980] sm:$0xff] }
 0x101   :  { %4917 = vst [vmem:[#allocation264_spill] sm:$0xff] %v3757_v9  ;;  %v3782_v9 = vld [vmem:[%s4657_s4 + $0x988] sm:$0xff] }
 0x102   :  { %4918 = vst [vmem:[#allocation265_spill] sm:$0xff] %v3762_v11  ;;  %v3787_v11 = vld [vmem:[%s4657_s4 + $0x990] sm:$0xff] }
 0x103   :  { %4919 = vst [vmem:[#allocation266_spill] sm:$0xff] %v3767_v58  ;;  %v3792_v58 = vld [vmem:[%s4657_s4 + $0x998] sm:$0xff] }
 0x104   :  { %4920 = vst [vmem:[#allocation267_spill] sm:$0xff] %v3772_v17  ;;  %v3797_v17 = vld [vmem:[%s4657_s4 + $0x9a0] sm:$0xff] }
 0x105   :  { %4921 = vst [vmem:[#allocation268_spill] sm:$0xff] %v3777_v19  ;;  %v3802_v19 = vld [vmem:[%s4657_s4 + $0x9a8] sm:$0xff] }
 0x106   :  { %4922 = vst [vmem:[#allocation269_spill] sm:$0xff] %v3782_v9  ;;  %v3807_v9 = vld [vmem:[%s4657_s4 + $0x9b0] sm:$0xff] }
 0x107   :  { %4923 = vst [vmem:[#allocation270_spill] sm:$0xff] %v3787_v11  ;;  %v3812_v11 = vld [vmem:[%s4657_s4 + $0x9b8] sm:$0xff] }
 0x108   :  { %4924 = vst [vmem:[#allocation271_spill] sm:$0xff] %v3792_v58  ;;  %v3817_v58 = vld [vmem:[%s4657_s4 + $0x9c0] sm:$0xff] }
 0x109   :  { %4925 = vst [vmem:[#allocation272_spill] sm:$0xff] %v3797_v17  ;;  %v3822_v17 = vld [vmem:[%s4657_s4 + $0x9c8] sm:$0xff] }
 0x10a   :  { %4926 = vst [vmem:[#allocation273_spill] sm:$0xff] %v3802_v19  ;;  %v3827_v19 = vld [vmem:[%s4657_s4 + $0x9d0] sm:$0xff] }
 0x10b   :  { %4927 = vst [vmem:[#allocation274_spill] sm:$0xff] %v3807_v9  ;;  %v3832_v9 = vld [vmem:[%s4657_s4 + $0x9d8] sm:$0xff] }
 0x10c   :  { %4928 = vst [vmem:[#allocation275_spill] sm:$0xff] %v3812_v11  ;;  %v3837_v11 = vld [vmem:[%s4657_s4 + $0x9e0] sm:$0xff] }
 0x10d   :  { %4929 = vst [vmem:[#allocation276_spill] sm:$0xff] %v3817_v58  ;;  %v3842_v58 = vld [vmem:[%s4657_s4 + $0x9e8] sm:$0xff] }
 0x10e   :  { %4930 = vst [vmem:[#allocation277_spill] sm:$0xff] %v3822_v17  ;;  %v3847_v17 = vld [vmem:[%s4657_s4 + $0x9f0] sm:$0xff] }
 0x10f   :  { %4931 = vst [vmem:[#allocation278_spill] sm:$0xff] %v3827_v19  ;;  %v3852_v19 = vld [vmem:[%s4657_s4 + $0x9f8] sm:$0xff] }
 0x110   :  { %4932 = vst [vmem:[#allocation279_spill] sm:$0xff] %v3832_v9 }
 0x111   :  { %4933 = vst [vmem:[#allocation280_spill] sm:$0xff] %v3837_v11 }
 0x112   :  { %4934 = vst [vmem:[#allocation281_spill] sm:$0xff] %v3842_v58 }
 0x113   :  { %4935 = vst [vmem:[#allocation282_spill] sm:$0xff] %v3847_v17 }
 0x114   :  { %4936 = vst [vmem:[#allocation283_spill] sm:$0xff] %v3852_v19 }
 0x115   :  { %683 = vsyncadd [#allocation3], 40960  ;;  %v692_v9 = vld [vmem:[%s4653_s0 + $0x30] sm:$0x3]  ;;  %vm714_vm0 = vcmask 1041408   ;;  %v689_v58 = vld [vmem:[%s4653_s0 + $0x18] sm:$0xff] }
 0x116   :  { %2129 = vmatpush.msk.msra.mxu0 %vm714_vm0, %v692_v9  ;;  %v693_v17 = vld [vmem:[%s4653_s0 + $0x38] sm:$0x3]  ;;  %v694_v11 = vld [vmem:[%s4653_s0 + $0x40] sm:$0x3]  ;;  %v691_v23 = vld [vmem:[%s4653_s0 + $0x28] sm:$0xff]  ;;  %v2207_v13 = vmov 0  }
 0x117   :  { %v690_v19 = vld [vmem:[%s4653_s0 + $0x20] sm:$0xff]  ;;  %2132 = vmatpush.msk.msra.mxu1 %vm714_vm0, %v693_v17  ;;  %2135 = vmatpush.msk.msra.mxu2 %vm714_vm0, %v694_v11  ;;  %v687_v21 = vld [vmem:[%s4653_s0 + $0x8] sm:$0xff]  ;;  %v688_v62 = vld [vmem:[%s4653_s0 + $0x10] sm:$0xff]  ;;  %vm707_vm1 = vcmask 146432   ;;  %vm839_vm2 = vcmask 523264  }
 0x118   :  { %v686_v9 = vld [vmem:[%s4653_s0] sm:$0xff]  ;;  %738 = vmatpush.msra.mxu0 %v689_v58  ;;  %2177 = vset.pattern.permute.xlu0 %v2207_v13  ;;  %v814_v58 = vld [vmem:[%s4656_s3 + $0x78] sm:$0xff] }
 0x119   :  { %v695_v11 = vld [vmem:[%s4655_s2] sm:$0xff]  ;;  %761 = vmatpush.msra.mxu1 %v690_v19  ;;  %784 = vmatpush.msra.mxu2 %v691_v23  ;;  %v830_v13 = vld [vmem:[%s4656_s3 + $0xf8] sm:$0xff]  ;;  %v813_v19 = vld [vmem:[%s4656_s3 + $0x70] sm:$0xff] }
 0x11a   :  { %v684_v17 = vld [vmem:[%s4654_s1] sm:$0xff]  ;;  %739 = vmatpush.msra.mxu0 %v686_v9  ;;  %699 = vperm.xlu0 %2177, %v695_v11   ;;  %v812_v23 = vld [vmem:[%s4656_s3 + $0x68] sm:$0xff] }
 0x11b   :  { %762 = vmatpush.msra.mxu1 %v687_v21  ;;  %785 = vmatpush.msra.mxu2 %v688_v62  ;;  %v829_v21 = vld [vmem:[%s4656_s3 + $0xf0] sm:$0xff]  ;;  %v696_v62 = vld [vmem:[%s4655_s2 + $0x8] sm:$0xff]  ;;  %v811_v11 = vld [vmem:[%s4656_s3 + $0x60] sm:$0xff] }
 0x11c   :  { %2130 = vmatmul.msk.f32.vlgmr.msra.gmra.mxu0 %vm707_vm1, %v684_v17  ;;  %2133 = vmatmul.msk.f32.vlgmr.msra.gmra.mxu1 %vm707_vm1, %v684_v17  ;;  %v828_v9 = vld [vmem:[%s4656_s3 + $0xe8] sm:$0xff] }
 0x11d   :  { %2136 = vmatmul.msk.f32.vlgmr.msra.gmra.mxu2 %vm707_vm1, %v684_v17  ;;  %846 = vmatpush.msra.mxu3 %v814_v58  ;;  %v685_v17 = vld [vmem:[%s4654_s1 + $0x8] sm:$0xff]  ;;  %v827_v58 = vld [vmem:[%s4656_s3 + $0xe0] sm:$0xff] }
 0x11e   :  { %869 = vmatpush.msrb.mxu0 %v830_v13  ;;  %v810_v13 = vld [vmem:[%s4656_s3 + $0x58] sm:$0xff]  ;;  %1010 = vmatpush.msrb.mxu2 %v2637_v42 }
 0x11f   :  { %847 = vmatpush.msra.mxu3 %v813_v19  ;;  %v826_v19 = vld [vmem:[%s4656_s3 + $0xd8] sm:$0xff] }
 0x120   :  { %870 = vmatpush.msrb.mxu0 %v829_v21  ;;  %v809_v21 = vld [vmem:[%s4656_s3 + $0x50] sm:$0xff] }
 0x121   :  { %848 = vmatpush.msra.mxu3 %v812_v23  ;;  %v825_v23 = vld [vmem:[%s4656_s3 + $0xd0] sm:$0xff] }
 0x122   :  { %704 = vperm.xlu0 %2177, %v696_v62   ;;  %871 = vmatpush.msrb.mxu0 %v828_v9  ;;  %v808_v62 = vld [vmem:[%s4656_s3 + $0x48] sm:$0xff] }
 0x123   :  { %849 = vmatpush.msra.mxu3 %v811_v11  ;;  %v824_v9 = vld [vmem:[%s4656_s3 + $0xc8] sm:$0xff]  ;;  %v807_v11 = vld [vmem:[%s4656_s3 + $0x40] sm:$0xff] }
 0x124   :  { %2131 = vmatmul.msk.f32.gmra.mxu0 %vm707_vm1, %v685_v17  ;;  %2134 = vmatmul.msk.f32.gmra.mxu1 %vm707_vm1, %v685_v17 }
 0x125   :  { %2137 = vmatmul.msk.f32.gmra.mxu2 %vm707_vm1, %v685_v17  ;;  %872 = vmatpush.msrb.mxu0 %v827_v58  ;;  %v823_v17 = vld [vmem:[%s4656_s3 + $0xc0] sm:$0xff]  ;;  %v806_v58 = vld [vmem:[%s4656_s3 + $0x38] sm:$0xff] }
 0x126   :  { %850 = vmatpush.msra.mxu3 %v810_v13  ;;  %v822_v13 = vld [vmem:[%s4656_s3 + $0xb8] sm:$0xff] }
 0x127   :  { %873 = vmatpush.msrb.mxu0 %v826_v19  ;;  %v805_v19 = vld [vmem:[%s4656_s3 + $0x30] sm:$0xff] }
 0x128   :  { %851 = vmatpush.msra.mxu3 %v809_v21  ;;  %v821_v21 = vld [vmem:[%s4656_s3 + $0xb0] sm:$0xff] }
 0x129   :  { %874 = vmatpush.msrb.mxu0 %v825_v23  ;;  %v804_v23 = vld [vmem:[%s4656_s3 + $0x28] sm:$0xff] }
 0x12a   :  { %852 = vmatpush.msra.mxu3 %v808_v62  ;;  %v820_v62 = vld [vmem:[%s4656_s3 + $0xa8] sm:$0xff] }
 0x12b   :  { %875 = vmatpush.msrb.mxu0 %v824_v9  ;;  %v803_v9 = vld [vmem:[%s4656_s3 + $0x20] sm:$0xff] }
 0x12c   :  { %853 = vmatpush.msra.mxu3 %v807_v11  ;;  %v838_v11 = vld [vmem:[%s4656_s3 + $0x138] sm:$0xff] }
 0x12d   :  { %876 = vmatpush.msrb.mxu0 %v823_v17  ;;  %v819_v17 = vld [vmem:[%s4656_s3 + $0xa0] sm:$0xff]  ;;  %900 = vmatpush.msrb.mxu1 %v838_v11  ;;  %v816_v11 = vld [vmem:[%s4656_s3 + $0x88] sm:$0xff] }
 0x12e   :  { %854 = vmatpush.msra.mxu3 %v806_v58  ;;  %v802_v58 = vld [vmem:[%s4656_s3 + $0x18] sm:$0xff] }
 0x12f   :  { %877 = vmatpush.msrb.mxu0 %v822_v13  ;;  %v837_v13 = vld [vmem:[%s4656_s3 + $0x130] sm:$0xff] }
 0x130   :  { %855 = vmatpush.msra.mxu3 %v805_v19  ;;  %v818_v19 = vld [vmem:[%s4656_s3 + $0x98] sm:$0xff]  ;;  %901 = vmatpush.msrb.mxu1 %v837_v13  ;;  %v815_v13 = vld [vmem:[%s4656_s3 + $0x80] sm:$0xff] }
 0x131   :  { %878 = vmatpush.msrb.mxu0 %v821_v21  ;;  %v801_v21 = vld [vmem:[%s4656_s3 + $0x10] sm:$0xff] }
 0x132   :  { %856 = vmatpush.msra.mxu3 %v804_v23  ;;  %v817_v23 = vld [vmem:[%s4656_s3 + $0x90] sm:$0xff] }
 0x133   :  { %879 = vmatpush.msrb.mxu0 %v820_v62  ;;  %v836_v62 = vld [vmem:[%s4656_s3 + $0x128] sm:$0xff] }
 0x134   :  { %857 = vmatpush.msra.mxu3 %v803_v9  ;;  %902 = vmatpush.msrb.mxu1 %v836_v62  ;;  %v800_v9 = vld [vmem:[%s4656_s3 + $0x8] sm:$0xff]  ;;  %v831_v62 = vld [vmem:[%s4656_s3 + $0x100] sm:$0xff] }
 0x135   :  { %880 = vmatpush.msrb.mxu0 %v819_v17  ;;  %v835_v17 = vld [vmem:[%s4656_s3 + $0x120] sm:$0xff] }
 0x136   :  { %858 = vmatpush.msra.mxu3 %v802_v58  ;;  %v799_v58 = vld [vmem:[%s4656_s3] sm:$0xff]  ;;  %903 = vmatpush.msrb.mxu1 %v835_v17 }
 0x137   :  { %881 = vmatpush.msrb.mxu0 %v818_v19  ;;  %v834_v19 = vld [vmem:[%s4656_s3 + $0x118] sm:$0xff] }
 0x138   :  { %859 = vmatpush.msra.mxu3 %v801_v21  ;;  %904 = vmatpush.msrb.mxu1 %v834_v19  ;;  %v833_v21 = vld [vmem:[%s4656_s3 + $0x110] sm:$0xff] }
 0x139   :  { %882 = vmatpush.msrb.mxu0 %v817_v23  ;;  %v832_v23 = vld [vmem:[%s4656_s3 + $0x108] sm:$0xff] }
 0x13a   :  { %860 = vmatpush.msra.mxu3 %v800_v9  ;;  %905 = vmatpush.msrb.mxu1 %v833_v21 }
 0x13b   :  { %883 = vmatpush.msrb.mxu0 %v816_v11 }
 0x13c   :  { %861 = vmatpush.msra.mxu3 %v799_v58  ;;  %906 = vmatpush.msrb.mxu1 %v832_v23 }
 0x13d   :  { %884 = vmatpush.msrb.mxu0 %v815_v13 }
 0x13e   :  { %907 = vmatpush.msrb.mxu1 %v831_v62 }
 0x140   :  { %1030 = vmatpush.msra.mxu1 %v2642_v7 }
 0x18c   :  { %v700_v9 = vpop.permute.xlu0 %699 }
 0x194   :  { %v705_v21 = vpop.permute.xlu0 %704 }
 0x199   :  { %v741_v11 = vpop.f32.mrf.mxu0  ;;  %v764_v17 = vpop.f32.mrf.mxu1 }
 0x19a   :  { %v742_v58 = vadd.f32 %v741_v11, %v700_v9  ;;  %v765_v13 = vadd.f32 %v764_v17, %v700_v9 }
 0x19c   :  { %v793_v19 = vmax.f32 %v742_v58, 0.0  ;;  %v794_v27 = vmax.f32 %v765_v13, 0.0 }
 0x19e   :  { %862 = vmatmul.f32.vlgmr.msra.gmra.mxu3 %v793_v19  ;;  %885 = vmatmul.f32.vlgmr.msrb.gmra.mxu0 %v794_v27 }
 0x1a0   :  { %v787_v25 = vpop.f32.mrf.mxu2 }
 0x1a1   :  { %v788_v10 = vadd.f32 %v787_v25, %v700_v9  ;;  %v744_v15 = vpop.f32.mrf.mxu0  ;;  %v767_v31 = vpop.f32.mrf.mxu1 }
 0x1a2   :  { %v745_v23 = vadd.f32 %v744_v15, %v705_v21  ;;  %v768_v29 = vadd.f32 %v767_v31, %v705_v21 }
 0x1a3   :  { %v795_v26 = vmax.f32 %v788_v10, 0.0 }
 0x1a4   :  { %v796_v50 = vmax.f32 %v745_v23, 0.0  ;;  %v797_v62 = vmax.f32 %v768_v29, 0.0 }
 0x1a5   :  { %2138 = vmatmul.msk.f32.vlgmr.msrb.gmra.mxu1 %vm839_vm2, %v795_v26 }
 0x1a6   :  { %865 = vmatmul.f32.gmra.mxu3 %v796_v50  ;;  %888 = vmatmul.f32.gmra.mxu0 %v797_v62 }
 0x1a8   :  { %v790_v11 = vpop.f32.mrf.mxu2 }
 0x1a9   :  { %v791_v17 = vadd.f32 %v790_v11, %v705_v21 }
 0x1ab   :  { %v798_v58 = vmax.f32 %v791_v17, 0.0 }
 0x1ad   :  { %2139 = vmatmul.msk.f32.gmra.mxu1 %vm839_vm2, %v798_v58 }
 0x21b   :  { %v886_v13 = vpop.f32.mrf.mxu0 }
 0x221   :  { %v863_v27 = vpop.f32.mrf.mxu3 }
 0x222   :  { %v887_v19 = vadd.f32 %v886_v13, %v863_v27  ;;  %v909_v35 = vpop.f32.mrf.mxu1 }
 0x223   :  { %v889_v9 = vpop.f32.mrf.mxu0 }
 0x224   :  { %v4019_v25 = vadd.f32 %v909_v35, %v887_v19 }
 0x229   :  { %v866_v15 = vpop.f32.mrf.mxu3 }
 0x22a   :  { %v890_v31 = vadd.f32 %v889_v9, %v866_v15  ;;  %v912_v33 = vpop.f32.mrf.mxu1 }
 0x22c   :  { %v4021_v10 = vadd.f32 %v912_v33, %v890_v31 }
 0x22d   :  { %2203 = dma.done.wait [#allocation3], 40960 }
 0x22e   :  { %2204 = vsyncadd [#allocation3], 4294926336  ;;  %1070 = vmatpush.msrb.mxu3 %v2652_v46  ;;  %1092 = vmatpush.msra.mxu0 %v2437_v36  ;;  %v4941_v7 = vld [vmem:[#allocation30_spill] sm:$0xff]  ;;  %v4953_v26 = vld [vmem:[#allocation21_spill] sm:$0xff]  ;;  %vm1001_vm3 = vcmask 654336   ;;  %vm2017_vm4 = vcmask 1043456  }
 0x22f   :  { %1011 = vmatpush.msrb.mxu2 %v2617_v34  ;;  %1031 = vmatpush.msra.mxu1 %v2622_v38  ;;  %v4955_v29 = vld [vmem:[#allocation61_spill] sm:$0xff]  ;;  %v4958_v33 = vld [vmem:[#allocation20_spill] sm:$0xff]  ;;  %v4960_v35 = vld [vmem:[#allocation39_spill] sm:$0xff]  ;;  %vm2013_vm5 = vcmask 949248   ;;  %s2208_s27 = smov [#allocation4]   ;;  %s2110_s30 = sshll.u32 %s4661_s8, 4  ;;  %s2111_s30 = int_to_ptr.hbm [resolvable:$true] %s2110_s30 }
 0x230   :  { %1071 = vmatpush.msrb.mxu3 %v2632_v1  ;;  %1093 = vmatpush.msra.mxu0 %v2417_v32  ;;  %v4937_v1 = vld [vmem:[#allocation33_spill] sm:$0xff]  ;;  %v4957_v32 = vld [vmem:[#allocation18_spill] sm:$0xff]  ;;  %v4961_v36 = vld [vmem:[#allocation15_spill] sm:$0xff]  ;;  %s2108_s28 = sshll.u32 %s2208_s27, 4  ;;  %vm2101_vm6 = vcmask 9216   ;;  %s2109_s28 = int_to_ptr.vmem [resolvable:$true] %s2108_s28 }
 0x231   :  { %1012 = vmatpush.msrb.mxu2 %v2597_v18  ;;  %1032 = vmatpush.msra.mxu1 %v2602_v22  ;;  %v4949_v18 = vld [vmem:[#allocation24_spill] sm:$0xff]  ;;  %v4951_v22 = vld [vmem:[#allocation65_spill] sm:$0xff]  ;;  %v4966_v42 = vld [vmem:[#allocation14_spill] sm:$0xff] }
 0x232   :  { %1072 = vmatpush.msrb.mxu3 %v2612_v30  ;;  %1094 = vmatpush.msra.mxu0 %v2397_v28  ;;  %v4954_v28 = vld [vmem:[#allocation23_spill] sm:$0xff]  ;;  %v4956_v30 = vld [vmem:[#allocation40_spill] sm:$0xff]  ;;  %v4959_v34 = vld [vmem:[#allocation57_spill] sm:$0xff] }
 0x233   :  { %1013 = vmatpush.msrb.mxu2 %v2577_v2  ;;  %1033 = vmatpush.msra.mxu1 %v2582_v6  ;;  %v4938_v2 = vld [vmem:[#allocation35_spill] sm:$0xff]  ;;  %v4940_v6 = vld [vmem:[#allocation44_spill] sm:$0xff]  ;;  %v4963_v38 = vld [vmem:[#allocation53_spill] sm:$0xff] }
 0x234   :  { %1073 = vmatpush.msrb.mxu3 %v2592_v14  ;;  %1095 = vmatpush.msra.mxu0 %v2377_v24  ;;  %v4946_v14 = vld [vmem:[#allocation29_spill] sm:$0xff]  ;;  %v4970_v46 = vld [vmem:[#allocation11_spill] sm:$0xff]  ;;  %v4985_v21 = vld [vmem:[#allocation70_spill] sm:$0xff] }
 0x235   :  { %1014 = vmatpush.msrb.mxu2 %v2557_v60  ;;  %1034 = vmatpush.msra.mxu1 %v2562_v61  ;;  %v4952_v24 = vld [vmem:[#allocation41_spill] sm:$0xff]  ;;  %v4974_v50 = vld [vmem:[#allocation83_spill] sm:$0xff]  ;;  %v4982_v60 = vld [vmem:[#allocation76_spill] sm:$0xff] }
 0x236   :  { %1074 = vmatpush.msrb.mxu3 %v2572_v63  ;;  %1096 = vmatpush.msra.mxu0 %v2357_v20  ;;  %v4950_v20 = vld [vmem:[#allocation26_spill] sm:$0xff]  ;;  %v4983_v61 = vld [vmem:[#allocation112_spill] sm:$0xff]  ;;  %v4988_v11 = vld [vmem:[#allocation25_spill] sm:$0xff] }
 0x237   :  { %1015 = vmatpush.msrb.mxu2 %v2537_v56  ;;  %1035 = vmatpush.msra.mxu1 %v2542_v57  ;;  %v4980_v56 = vld [vmem:[#allocation31_spill] sm:$0xff]  ;;  %v4981_v57 = vld [vmem:[#allocation74_spill] sm:$0xff]  ;;  %v4984_v63 = vld [vmem:[#allocation28_spill] sm:$0xff] }
 0x238   :  { %1075 = vmatpush.msrb.mxu3 %v2552_v59  ;;  %1097 = vmatpush.msra.mxu0 %v2337_v16  ;;  %v4948_v16 = vld [vmem:[#allocation42_spill] sm:$0xff]  ;;  %v4120_v59 = vrot.slane %v4019_v25, 4  ;;  %v4986_v23 = vld [vmem:[#allocation72_spill] sm:$0xff]  ;;  %v4996_v31 = vld [vmem:[#allocation19_spill] sm:$0xff] }
 0x239   :  { %1016 = vmatpush.msrb.mxu2 %v2517_v52  ;;  %1036 = vmatpush.msra.mxu1 %v2522_v53  ;;  %v4976_v52 = vld [vmem:[#allocation34_spill] sm:$0xff]  ;;  %v4987_v62 = vld [vmem:[#allocation108_spill] sm:$0xff] }
 0x23a   :  { %1076 = vmatpush.msrb.mxu3 %v2532_v55  ;;  %1098 = vmatpush.msra.mxu0 %v2317_v12  ;;  %v4945_v12 = vld [vmem:[#allocation27_spill] sm:$0xff]  ;;  %v4977_v53 = vld [vmem:[#allocation78_spill] sm:$0xff]  ;;  %v4979_v55 = vld [vmem:[#allocation116_spill] sm:$0xff] }
 0x23b   :  { %1017 = vmatpush.msrb.mxu2 %v2497_v48  ;;  %1037 = vmatpush.msra.mxu1 %v2502_v49  ;;  %v4972_v48 = vld [vmem:[#allocation36_spill] sm:$0xff]  ;;  %v4973_v49 = vld [vmem:[#allocation81_spill] sm:$0xff]  ;;  %v4989_v17 = vld [vmem:[#allocation66_spill] sm:$0xff] }
 0x23c   :  { %1077 = vmatpush.msrb.mxu3 %v2512_v51  ;;  %1099 = vmatpush.msra.mxu0 %v2297_v8  ;;  %v4944_v8 = vld [vmem:[#allocation43_spill] sm:$0xff]  ;;  %v4975_v51 = vld [vmem:[#allocation120_spill] sm:$0xff]  ;;  %v4992_v27 = vld [vmem:[#allocation22_spill] sm:$0xff] }
 0x23d   :  { %1018 = vmatpush.msrb.mxu2 %v2477_v44  ;;  %1038 = vmatpush.msra.mxu1 %v2482_v45  ;;  %v4968_v44 = vld [vmem:[#allocation37_spill] sm:$0xff]  ;;  %v4990_v58 = vld [vmem:[#allocation68_spill] sm:$0xff]  ;;  %v4993_v19 = vld [vmem:[#allocation62_spill] sm:$0xff] }
 0x23e   :  { %1078 = vmatpush.msrb.mxu3 %v2492_v47  ;;  %1100 = vmatpush.msra.mxu0 %v2277_v4  ;;  %v4939_v4 = vld [vmem:[#allocation77_spill] sm:$0xff]  ;;  %v4991_v13 = vld [vmem:[#allocation104_spill] sm:$0xff] }
 0x23f   :  { %1019 = vmatpush.msrb.mxu2 %v2457_v40  ;;  %1039 = vmatpush.msra.mxu1 %v2462_v41  ;;  %v4965_v40 = vld [vmem:[#allocation12_spill] sm:$0xff]  ;;  %v1000_v41 = vrot.slane %v4019_v25, 2  ;;  %v4969_v45 = vld [vmem:[#allocation9_spill] sm:$0xff] }
 0x240   :  { %1079 = vmatpush.msrb.mxu3 %v2472_v43  ;;  %1101 = vmatpush.msra.mxu0 %v2257_v0  ;;  %v4942_v0 = vld [vmem:[#allocation32_spill] sm:$0xff]  ;;  %v4967_v43 = vld [vmem:[#allocation49_spill] sm:$0xff] }
 0x241   :  { %1050 = vmatpush.msra.mxu2 %v2647_v5  ;;  %1112 = vmatpush.msrb.mxu1 %v2442_v37  ;;  %v4943_v5 = vld [vmem:[#allocation73_spill] sm:$0xff]  ;;  %v4994_v9 = vld [vmem:[#allocation64_spill] sm:$0xff] }
 0x242   :  { %1152 = vmatpush.msra.mxu3 %v2452_v39  ;;  %1215 = vmatpush.msrb.mxu0 %v2837_v54  ;;  %v4962_v37 = vld [vmem:[#allocation17_spill] sm:$0xff]  ;;  %v4964_v39 = vld [vmem:[#allocation38_spill] sm:$0xff]  ;;  %v4978_v54 = vld [vmem:[#allocation80_spill] sm:$0xff] }
 0x243   :  { %1051 = vmatpush.msra.mxu2 %v2627_v3  ;;  %1113 = vmatpush.msrb.mxu1 %v4937_v1  ;;  %v4947_v3 = vld [vmem:[#allocation69_spill] sm:$0xff]  ;;  %v4995_v15 = vld [vmem:[#allocation100_spill] sm:$0xff]  ;;  %v4997_v1 = vld [vmem:[#allocation58_spill] sm:$0xff] }
 0x244   :  { %1153 = vmatpush.msra.mxu3 %v4938_v2  ;;  %1216 = vmatpush.msrb.mxu0 %v4939_v4  ;;  %v4971_v47 = vld [vmem:[#allocation45_spill] sm:$0xff]  ;;  %v4998_v2 = vld [vmem:[#allocation60_spill] sm:$0xff] }
 0x245   :  { %1052 = vmatpush.msra.mxu2 %v4940_v6  ;;  %1114 = vmatpush.msrb.mxu1 %v4941_v7  ;;  %v4999_v4 = vld [vmem:[#allocation96_spill] sm:$0xff]  ;;  %v5001_v7 = vld [vmem:[#allocation54_spill] sm:$0xff] }
 0x246   :  { %1154 = vmatpush.msra.mxu3 %v4942_v0  ;;  %1217 = vmatpush.msrb.mxu0 %v4943_v5  ;;  %v5000_v6 = vld [vmem:[#allocation16_spill] sm:$0xff] }
 0x247   :  { %1053 = vmatpush.msra.mxu2 %v4944_v8  ;;  %1115 = vmatpush.msrb.mxu1 %v4945_v12  ;;  %v5002_v0 = vld [vmem:[#allocation56_spill] sm:$0xff]  ;;  %v5004_v8 = vld [vmem:[#allocation13_spill] sm:$0xff]  ;;  %v5005_v12 = vld [vmem:[#allocation50_spill] sm:$0xff] }
 0x248   :  { %1155 = vmatpush.msra.mxu3 %v4946_v14  ;;  %1218 = vmatpush.msrb.mxu0 %v4947_v3  ;;  %v5003_v5 = vld [vmem:[#allocation92_spill] sm:$0xff]  ;;  %v4153_v3 = vrot.slane %v4019_v25, 6 }
 0x249   :  { %1054 = vmatpush.msra.mxu2 %v4948_v16  ;;  %1116 = vmatpush.msrb.mxu1 %v4949_v18  ;;  %v5006_v14 = vld [vmem:[#allocation52_spill] sm:$0xff]  ;;  %v5008_v18 = vld [vmem:[#allocation10_spill] sm:$0xff] }
 0x24a   :  { %1156 = vmatpush.msra.mxu3 %v4950_v20  ;;  %1219 = vmatpush.msrb.mxu0 %v4951_v22  ;;  %v5007_v16 = vld [vmem:[#allocation88_spill] sm:$0xff]  ;;  %v5009_v20 = vld [vmem:[#allocation46_spill] sm:$0xff] }
 0x24b   :  { %1055 = vmatpush.msra.mxu2 %v4952_v24  ;;  %1117 = vmatpush.msrb.mxu1 %v4953_v26  ;;  %v5010_v22 = vld [vmem:[#allocation48_spill] sm:$0xff]  ;;  %v5012_v26 = vld [vmem:[#allocation82_spill] sm:$0xff] }
 0x24c   :  { %1157 = vmatpush.msra.mxu3 %v4954_v28  ;;  %1220 = vmatpush.msrb.mxu0 %v4955_v29  ;;  %v5011_v24 = vld [vmem:[#allocation84_spill] sm:$0xff]  ;;  %v5013_v28 = vld [vmem:[#allocation121_spill] sm:$0xff]  ;;  %v5014_v29 = vld [vmem:[#allocation123_spill] sm:$0xff] }
 0x24d   :  { %1056 = vmatpush.msra.mxu2 %v4956_v30  ;;  %1118 = vmatpush.msrb.mxu1 %v4957_v32  ;;  %v5015_v30 = vld [vmem:[#allocation160_spill] sm:$0xff]  ;;  %v5016_v32 = vld [vmem:[#allocation79_spill] sm:$0xff] }
 0x24e   :  { %1158 = vmatpush.msra.mxu3 %v4958_v33  ;;  %1221 = vmatpush.msrb.mxu0 %v4959_v34  ;;  %v5017_v33 = vld [vmem:[#allocation117_spill] sm:$0xff]  ;;  %v5018_v34 = vld [vmem:[#allocation119_spill] sm:$0xff] }
 0x24f   :  { %1057 = vmatpush.msra.mxu2 %v4960_v35  ;;  %1119 = vmatpush.msrb.mxu1 %v4961_v36  ;;  %v5019_v35 = vld [vmem:[#allocation156_spill] sm:$0xff]  ;;  %v5021_v36 = vld [vmem:[#allocation113_spill] sm:$0xff] }
 0x250   :  { %1159 = vmatpush.msra.mxu3 %v4962_v37  ;;  %1222 = vmatpush.msrb.mxu0 %v4963_v38  ;;  %v5022_v37 = vld [vmem:[#allocation115_spill] sm:$0xff]  ;;  %v5023_v38 = vld [vmem:[#allocation152_spill] sm:$0xff] }
 0x251   :  { %1058 = vmatpush.msra.mxu2 %v4964_v39  ;;  %1120 = vmatpush.msrb.mxu1 %v4965_v40  ;;  %v5024_v39 = vld [vmem:[#allocation71_spill] sm:$0xff]  ;;  %v5025_v40 = vld [vmem:[#allocation109_spill] sm:$0xff] }
 0x252   :  { %1160 = vmatpush.msra.mxu3 %v4966_v42  ;;  %1223 = vmatpush.msrb.mxu0 %v4967_v43  ;;  %v5027_v42 = vld [vmem:[#allocation148_spill] sm:$0xff]  ;;  %v5028_v43 = vld [vmem:[#allocation67_spill] sm:$0xff] }
 0x253   :  { %1059 = vmatpush.msra.mxu2 %v4968_v44  ;;  %1121 = vmatpush.msrb.mxu1 %v4969_v45  ;;  %v5029_v44 = vld [vmem:[#allocation105_spill] sm:$0xff]  ;;  %v5030_v45 = vld [vmem:[#allocation107_spill] sm:$0xff] }
 0x254   :  { %1161 = vmatpush.msra.mxu3 %v4970_v46  ;;  %1224 = vmatpush.msrb.mxu0 %v4971_v47  ;;  %v5031_v46 = vld [vmem:[#allocation144_spill] sm:$0xff]  ;;  %v5032_v47 = vld [vmem:[#allocation63_spill] sm:$0xff] }
 0x255   :  { %2140 = vmatmul.msk.f32.vlgmr.msrb.gmra.mxu2 %vm1001_vm3, %v1000_v41  ;;  %2141 = vmatmul.msk.f32.vlgmr.msra.gmra.mxu1 %vm1001_vm3, %v1000_v41 }
 0x256   :  { %2143 = vmatmul.msk.f32.vlgmr.msrb.gmra.mxu3 %vm1001_vm3, %v1000_v41  ;;  %2144 = vmatmul.msk.f32.vlgmr.msra.gmra.mxu0 %vm1001_vm3, %v4019_v25 }
 0x257   :  { %1132 = vmatpush.msrb.mxu2 %v4972_v48  ;;  %1235 = vmatpush.msra.mxu1 %v4973_v49  ;;  %v5033_v48 = vld [vmem:[#allocation101_spill] sm:$0xff]  ;;  %v5034_v49 = vld [vmem:[#allocation103_spill] sm:$0xff] }
 0x258   :  { %1275 = vmatpush.msrb.mxu3 %v4974_v50  ;;  %1342 = vmatpush.msra.mxu0 %v4975_v51  ;;  %v5035_v50 = vld [vmem:[#allocation140_spill] sm:$0xff]  ;;  %v5036_v51 = vld [vmem:[#allocation59_spill] sm:$0xff] }
 0x259   :  { %1133 = vmatpush.msrb.mxu2 %v4976_v52  ;;  %1236 = vmatpush.msra.mxu1 %v4977_v53  ;;  %v5037_v52 = vld [vmem:[#allocation97_spill] sm:$0xff]  ;;  %v5038_v53 = vld [vmem:[#allocation99_spill] sm:$0xff] }
 0x25a   :  { %1276 = vmatpush.msrb.mxu3 %v4978_v54  ;;  %1343 = vmatpush.msra.mxu0 %v4979_v55  ;;  %v5039_v54 = vld [vmem:[#allocation136_spill] sm:$0xff]  ;;  %v5040_v55 = vld [vmem:[#allocation55_spill] sm:$0xff] }
 0x25b   :  { %1134 = vmatpush.msrb.mxu2 %v4980_v56  ;;  %1237 = vmatpush.msra.mxu1 %v4981_v57  ;;  %v5041_v56 = vld [vmem:[#allocation93_spill] sm:$0xff]  ;;  %v5042_v57 = vld [vmem:[#allocation95_spill] sm:$0xff] }
 0x25c   :  { %1277 = vmatpush.msrb.mxu3 %v4982_v60  ;;  %1344 = vmatpush.msra.mxu0 %v4983_v61  ;;  %v5043_v60 = vld [vmem:[#allocation132_spill] sm:$0xff]  ;;  %v5044_v61 = vld [vmem:[#allocation51_spill] sm:$0xff] }
 0x25d   :  { %1135 = vmatpush.msrb.mxu2 %v4984_v63  ;;  %1238 = vmatpush.msra.mxu1 %v4985_v21  ;;  %v5045_v63 = vld [vmem:[#allocation89_spill] sm:$0xff]  ;;  %v5046_v21 = vld [vmem:[#allocation91_spill] sm:$0xff] }
 0x25e   :  { %1278 = vmatpush.msrb.mxu3 %v4986_v23  ;;  %1345 = vmatpush.msra.mxu0 %v4987_v62  ;;  %v5047_v23 = vld [vmem:[#allocation128_spill] sm:$0xff]  ;;  %v5048_v62 = vld [vmem:[#allocation47_spill] sm:$0xff] }
 0x25f   :  { %1136 = vmatpush.msrb.mxu2 %v4988_v11  ;;  %2148 = vmatmul.msk.f32.vlgmr.msrb.gmra.mxu0 %vm1001_vm3, %v4120_v59  ;;  %v5049_v11 = vld [vmem:[#allocation85_spill] sm:$0xff] }
 0x260   :  { %1239 = vmatpush.msra.mxu1 %v4989_v17  ;;  %1279 = vmatpush.msrb.mxu3 %v4990_v58  ;;  %v5050_v17 = vld [vmem:[#allocation87_spill] sm:$0xff]  ;;  %v5051_v58 = vld [vmem:[#allocation124_spill] sm:$0xff] }
 0x261   :  { %1346 = vmatpush.msra.mxu0 %v4991_v13  ;;  %1137 = vmatpush.msrb.mxu2 %v4992_v27  ;;  %v5052_v13 = vld [vmem:[#allocation122_spill] sm:$0xff]  ;;  %v5053_v27 = vld [vmem:[#allocation161_spill] sm:$0xff] }
 0x262   :  { %1240 = vmatpush.msra.mxu1 %v4993_v19  ;;  %1280 = vmatpush.msrb.mxu3 %v4994_v9  ;;  %v5054_v19 = vld [vmem:[#allocation163_spill] sm:$0xff]  ;;  %v5055_v9 = vld [vmem:[#allocation200_spill] sm:$0xff] }
 0x263   :  { %1347 = vmatpush.msra.mxu0 %v4995_v15  ;;  %2142 = vmatmul.msk.f32.vlgmr.msra.gmra.mxu2 %vm1001_vm3, %v1000_v41  ;;  %v5026_v41 = vld [vmem:[#allocation111_spill] sm:$0xff]  ;;  %v5056_v15 = vld [vmem:[#allocation118_spill] sm:$0xff] }
 0x264   :  { %1138 = vmatpush.msrb.mxu2 %v4996_v31  ;;  %1241 = vmatpush.msra.mxu1 %v4997_v1  ;;  %v5058_v31 = vld [vmem:[#allocation159_spill] sm:$0xff]  ;;  %v5059_v1 = vld [vmem:[#allocation196_spill] sm:$0xff] }
 0x265   :  { %1281 = vmatpush.msrb.mxu3 %v4998_v2  ;;  %1348 = vmatpush.msra.mxu0 %v4999_v4  ;;  %v5060_v2 = vld [vmem:[#allocation114_spill] sm:$0xff]  ;;  %v5061_v4 = vld [vmem:[#allocation153_spill] sm:$0xff] }
 0x266   :  { %1139 = vmatpush.msrb.mxu2 %v5000_v6  ;;  %1242 = vmatpush.msra.mxu1 %v5001_v7  ;;  %v5062_v6 = vld [vmem:[#allocation155_spill] sm:$0xff]  ;;  %v5063_v7 = vld [vmem:[#allocation192_spill] sm:$0xff] }
 0x267   :  { %1282 = vmatpush.msrb.mxu3 %v5002_v0  ;;  %1349 = vmatpush.msra.mxu0 %v5003_v5  ;;  %v5064_v0 = vld [vmem:[#allocation110_spill] sm:$0xff]  ;;  %v5065_v5 = vld [vmem:[#allocation149_spill] sm:$0xff] }
 0x268   :  { %2147 = vmatmul.msk.f32.vlgmr.msra.gmra.mxu3 %vm1001_vm3, %v4019_v25  ;;  %1140 = vmatpush.msrb.mxu2 %v5004_v8  ;;  %v5066_v8 = vld [vmem:[#allocation151_spill] sm:$0xff] }
 0x269   :  { %1243 = vmatpush.msra.mxu1 %v5005_v12  ;;  %1283 = vmatpush.msrb.mxu3 %v5006_v14  ;;  %v5067_v12 = vld [vmem:[#allocation188_spill] sm:$0xff]  ;;  %v5068_v14 = vld [vmem:[#allocation106_spill] sm:$0xff] }
 0x26a   :  { %1350 = vmatpush.msra.mxu0 %v5007_v16  ;;  %1141 = vmatpush.msrb.mxu2 %v5008_v18  ;;  %v5069_v16 = vld [vmem:[#allocation145_spill] sm:$0xff]  ;;  %v5070_v18 = vld [vmem:[#allocation147_spill] sm:$0xff] }
 0x26b   :  { %1244 = vmatpush.msra.mxu1 %v5009_v20  ;;  %1284 = vmatpush.msrb.mxu3 %v5010_v22  ;;  %v5071_v20 = vld [vmem:[#allocation184_spill] sm:$0xff]  ;;  %v5072_v22 = vld [vmem:[#allocation102_spill] sm:$0xff] }
 0x26c   :  { %1351 = vmatpush.msra.mxu0 %v5011_v24  ;;  %2145 = vmatmul.msk.f32.vlgmr.msrb.gmra.mxu1 %vm1001_vm3, %v4019_v25  ;;  %v5073_v24 = vld [vmem:[#allocation141_spill] sm:$0xff] }
 0x26d   :  { %2146 = vmatmul.msk.f32.vlgmr.msrb.gmra.mxu2 %vm1001_vm3, %v4019_v25  ;;  %2152 = vmatmul.msk.f32.vlgmr.msra.gmra.mxu0 %vm1001_vm3, %v4153_v3  ;;  %v5020_v25 = vld [vmem:[#allocation75_spill] sm:$0xff] }
 0x26e   :  { %1255 = vmatpush.msra.mxu2 %v5012_v26  ;;  %1362 = vmatpush.msrb.mxu1 %v5013_v28  ;;  %v5074_v26 = vld [vmem:[#allocation143_spill] sm:$0xff]  ;;  %v5075_v28 = vld [vmem:[#allocation180_spill] sm:$0xff] }
 0x26f   :  { %1402 = vmatpush.msra.mxu3 %v5014_v29  ;;  %1469 = vmatpush.msrb.mxu0 %v5015_v30  ;;  %v5076_v29 = vld [vmem:[#allocation98_spill] sm:$0xff]  ;;  %v5077_v30 = vld [vmem:[#allocation137_spill] sm:$0xff] }
 0x270   :  { %1256 = vmatpush.msra.mxu2 %v5016_v32  ;;  %1363 = vmatpush.msrb.mxu1 %v5017_v33  ;;  %v5078_v32 = vld [vmem:[#allocation139_spill] sm:$0xff]  ;;  %v5079_v33 = vld [vmem:[#allocation176_spill] sm:$0xff] }
 0x271   :  { %1403 = vmatpush.msra.mxu3 %v5018_v34  ;;  %1470 = vmatpush.msrb.mxu0 %v5019_v35  ;;  %v5080_v34 = vld [vmem:[#allocation94_spill] sm:$0xff]  ;;  %v5081_v35 = vld [vmem:[#allocation133_spill] sm:$0xff] }
 0x272   :  { %1257 = vmatpush.msra.mxu2 %v5020_v25  ;;  %2151 = vmatmul.msk.f32.vlgmr.msrb.gmra.mxu3 %vm1001_vm3, %v4120_v59  ;;  %v5082_v25 = vld [vmem:[#allocation135_spill] sm:$0xff] }
 0x273   :  { %1364 = vmatpush.msrb.mxu1 %v5021_v36  ;;  %1404 = vmatpush.msra.mxu3 %v5022_v37  ;;  %v5083_v36 = vld [vmem:[#allocation172_spill] sm:$0xff]  ;;  %v5084_v37 = vld [vmem:[#allocation90_spill] sm:$0xff] }
 0x274   :  { %1471 = vmatpush.msrb.mxu0 %v5023_v38  ;;  %1258 = vmatpush.msra.mxu2 %v5024_v39  ;;  %v5085_v38 = vld [vmem:[#allocation129_spill] sm:$0xff]  ;;  %v5086_v39 = vld [vmem:[#allocation131_spill] sm:$0xff] }
 0x275   :  { %1365 = vmatpush.msrb.mxu1 %v5025_v40  ;;  %1405 = vmatpush.msra.mxu3 %v5026_v41  ;;  %v5087_v40 = vld [vmem:[#allocation168_spill] sm:$0xff]  ;;  %v5088_v41 = vld [vmem:[#allocation86_spill] sm:$0xff] }
 0x276   :  { %1472 = vmatpush.msrb.mxu0 %v5027_v42  ;;  %1259 = vmatpush.msra.mxu2 %v5028_v43  ;;  %v5089_v42 = vld [vmem:[#allocation125_spill] sm:$0xff]  ;;  %v4257_v43 = vrot.slane %v4021_v10, 2 }
 0x277   :  { %1366 = vmatpush.msrb.mxu1 %v5029_v44  ;;  %1406 = vmatpush.msra.mxu3 %v5030_v45  ;;  %v5090_v44 = vld [vmem:[#allocation127_spill] sm:$0xff]  ;;  %v5091_v45 = vld [vmem:[#allocation164_spill] sm:$0xff] }
 0x278   :  { %1473 = vmatpush.msrb.mxu0 %v5031_v46  ;;  %1260 = vmatpush.msra.mxu2 %v5032_v47  ;;  %v5092_v46 = vld [vmem:[#allocation162_spill] sm:$0xff]  ;;  %v5093_v47 = vld [vmem:[#allocation201_spill] sm:$0xff] }
 0x279   :  { %1367 = vmatpush.msrb.mxu1 %v5033_v48  ;;  %1407 = vmatpush.msra.mxu3 %v5034_v49  ;;  %v5094_v48 = vld [vmem:[#allocation203_spill] sm:$0xff]  ;;  %v5095_v49 = vld [vmem:[#allocation240_spill] sm:$0xff] }
 0x27a   :  { %1474 = vmatpush.msrb.mxu0 %v5035_v50  ;;  %2149 = vmatmul.msk.f32.vlgmr.msra.gmra.mxu1 %vm1001_vm3, %v4120_v59  ;;  %v5096_v50 = vld [vmem:[#allocation158_spill] sm:$0xff] }
 0x27b   :  { %1261 = vmatpush.msra.mxu2 %v5036_v51  ;;  %1368 = vmatpush.msrb.mxu1 %v5037_v52  ;;  %v5098_v51 = vld [vmem:[#allocation199_spill] sm:$0xff]  ;;  %v5099_v52 = vld [vmem:[#allocation236_spill] sm:$0xff] }
 0x27c   :  { %1408 = vmatpush.msra.mxu3 %v5038_v53  ;;  %1475 = vmatpush.msrb.mxu0 %v5039_v54  ;;  %v5100_v53 = vld [vmem:[#allocation154_spill] sm:$0xff]  ;;  %v5101_v54 = vld [vmem:[#allocation193_spill] sm:$0xff] }
 0x27d   :  { %1262 = vmatpush.msra.mxu2 %v5040_v55  ;;  %1369 = vmatpush.msrb.mxu1 %v5041_v56  ;;  %v5102_v55 = vld [vmem:[#allocation195_spill] sm:$0xff]  ;;  %v5103_v56 = vld [vmem:[#allocation232_spill] sm:$0xff] }
 0x27e   :  { %1409 = vmatpush.msra.mxu3 %v5042_v57  ;;  %1476 = vmatpush.msrb.mxu0 %v5043_v60  ;;  %v5104_v57 = vld [vmem:[#allocation150_spill] sm:$0xff]  ;;  %v5105_v60 = vld [vmem:[#allocation189_spill] sm:$0xff] }
 0x27f   :  { %1263 = vmatpush.msra.mxu2 %v5044_v61  ;;  %1370 = vmatpush.msrb.mxu1 %v5045_v63  ;;  %v5106_v61 = vld [vmem:[#allocation191_spill] sm:$0xff]  ;;  %v5107_v63 = vld [vmem:[#allocation228_spill] sm:$0xff] }
 0x280   :  { %1410 = vmatpush.msra.mxu3 %v5046_v21  ;;  %1477 = vmatpush.msrb.mxu0 %v5047_v23  ;;  %v5108_v21 = vld [vmem:[#allocation146_spill] sm:$0xff]  ;;  %v5109_v23 = vld [vmem:[#allocation185_spill] sm:$0xff] }
 0x281   :  { %1264 = vmatpush.msra.mxu2 %v5048_v62  ;;  %1371 = vmatpush.msrb.mxu1 %v5049_v11  ;;  %v5110_v62 = vld [vmem:[#allocation187_spill] sm:$0xff]  ;;  %v5111_v11 = vld [vmem:[#allocation224_spill] sm:$0xff] }
 0x282   :  { %1411 = vmatpush.msra.mxu3 %v5050_v17  ;;  %1478 = vmatpush.msrb.mxu0 %v5051_v58  ;;  %v5112_v17 = vld [vmem:[#allocation142_spill] sm:$0xff]  ;;  %v5113_v58 = vld [vmem:[#allocation181_spill] sm:$0xff] }
 0x283   :  { %2150 = vmatmul.msk.f32.vlgmr.msra.gmra.mxu2 %vm1001_vm3, %v4120_v59  ;;  %2153 = vmatmul.msk.f32.vlgmr.msrb.gmra.mxu1 %vm1001_vm3, %v4153_v3  ;;  %v5057_v59 = vld [vmem:[#allocation157_spill] sm:$0xff] }
 0x284   :  { %1382 = vmatpush.msrb.mxu2 %v5052_v13  ;;  %2155 = vmatmul.msk.f32.vlgmr.msra.gmra.mxu3 %vm1001_vm3, %v4153_v3  ;;  %v5114_v13 = vld [vmem:[#allocation183_spill] sm:$0xff] }
 0x285   :  { %2156 = vmatmul.msk.f32.vlgmr.msrb.gmra.mxu0 %vm1001_vm3, %v4021_v10  ;;  %1489 = vmatpush.msra.mxu1 %v5053_v27  ;;  %v5115_v27 = vld [vmem:[#allocation220_spill] sm:$0xff] }
 0x286   :  { %1529 = vmatpush.msrb.mxu3 %v5054_v19  ;;  %1596 = vmatpush.msra.mxu0 %v5055_v9  ;;  %v5116_v19 = vld [vmem:[#allocation138_spill] sm:$0xff]  ;;  %v5117_v9 = vld [vmem:[#allocation177_spill] sm:$0xff] }
 0x287   :  { %1383 = vmatpush.msrb.mxu2 %v5056_v15  ;;  %1490 = vmatpush.msra.mxu1 %v5057_v59  ;;  %v5118_v15 = vld [vmem:[#allocation179_spill] sm:$0xff]  ;;  %v5119_v59 = vld [vmem:[#allocation216_spill] sm:$0xff] }
 0x288   :  { %1530 = vmatpush.msrb.mxu3 %v5058_v31  ;;  %1597 = vmatpush.msra.mxu0 %v5059_v1  ;;  %v5120_v31 = vld [vmem:[#allocation134_spill] sm:$0xff]  ;;  %v5121_v1 = vld [vmem:[#allocation173_spill] sm:$0xff] }
 0x289   :  { %1384 = vmatpush.msrb.mxu2 %v5060_v2  ;;  %1491 = vmatpush.msra.mxu1 %v5061_v4  ;;  %v5122_v2 = vld [vmem:[#allocation175_spill] sm:$0xff]  ;;  %v5123_v4 = vld [vmem:[#allocation212_spill] sm:$0xff] }
 0x28a   :  { %1531 = vmatpush.msrb.mxu3 %v5062_v6  ;;  %1598 = vmatpush.msra.mxu0 %v5063_v7  ;;  %v5124_v6 = vld [vmem:[#allocation130_spill] sm:$0xff]  ;;  %v5125_v7 = vld [vmem:[#allocation169_spill] sm:$0xff] }
 0x28b   :  { %1385 = vmatpush.msrb.mxu2 %v5064_v0  ;;  %1492 = vmatpush.msra.mxu1 %v5065_v5  ;;  %v5126_v0 = vld [vmem:[#allocation171_spill] sm:$0xff]  ;;  %v5127_v5 = vld [vmem:[#allocation208_spill] sm:$0xff] }
 0x28c   :  { %1532 = vmatpush.msrb.mxu3 %v5066_v8  ;;  %1599 = vmatpush.msra.mxu0 %v5067_v12  ;;  %v5128_v8 = vld [vmem:[#allocation126_spill] sm:$0xff]  ;;  %v5129_v12 = vld [vmem:[#allocation165_spill] sm:$0xff] }
 0x28d   :  { %1386 = vmatpush.msrb.mxu2 %v5068_v14  ;;  %1493 = vmatpush.msra.mxu1 %v5069_v16  ;;  %v4308_v14 = vrot.slane %v4021_v10, 4  ;;  %v5130_v16 = vld [vmem:[#allocation167_spill] sm:$0xff] }
 0x28e   :  { %1533 = vmatpush.msrb.mxu3 %v5070_v18  ;;  %1600 = vmatpush.msra.mxu0 %v5071_v20  ;;  %v5131_v18 = vld [vmem:[#allocation204_spill] sm:$0xff]  ;;  %v5132_v20 = vld [vmem:[#allocation202_spill] sm:$0xff] }
 0x28f   :  { %1387 = vmatpush.msrb.mxu2 %v5072_v22  ;;  %1494 = vmatpush.msra.mxu1 %v5073_v24  ;;  %v5133_v22 = vld [vmem:[#allocation241_spill] sm:$0xff]  ;;  %v5134_v24 = vld [vmem:[#allocation243_spill] sm:$0xff] }
 0x290   :  { %1534 = vmatpush.msrb.mxu3 %v5074_v26  ;;  %1601 = vmatpush.msra.mxu0 %v5075_v28  ;;  %v5135_v26 = vld [vmem:[#allocation280_spill] sm:$0xff]  ;;  %v5136_v28 = vld [vmem:[#allocation198_spill] sm:$0xff] }
 0x291   :  { %1388 = vmatpush.msrb.mxu2 %v5076_v29  ;;  %1495 = vmatpush.msra.mxu1 %v5077_v30  ;;  %v5137_v29 = vld [vmem:[#allocation237_spill] sm:$0xff]  ;;  %v5138_v30 = vld [vmem:[#allocation239_spill] sm:$0xff] }
 0x292   :  { %1535 = vmatpush.msrb.mxu3 %v5078_v32  ;;  %1602 = vmatpush.msra.mxu0 %v5079_v33  ;;  %v5139_v32 = vld [vmem:[#allocation276_spill] sm:$0xff]  ;;  %v5140_v33 = vld [vmem:[#allocation194_spill] sm:$0xff] }
 0x293   :  { %1389 = vmatpush.msrb.mxu2 %v5080_v34  ;;  %1496 = vmatpush.msra.mxu1 %v5081_v35  ;;  %v5141_v34 = vld [vmem:[#allocation233_spill] sm:$0xff]  ;;  %v5142_v35 = vld [vmem:[#allocation235_spill] sm:$0xff] }
 0x294   :  { %1536 = vmatpush.msrb.mxu3 %v5082_v25  ;;  %1603 = vmatpush.msra.mxu0 %v5083_v36  ;;  %v5143_v25 = vld [vmem:[#allocation272_spill] sm:$0xff]  ;;  %v5144_v36 = vld [vmem:[#allocation190_spill] sm:$0xff] }
 0x295   :  { %1390 = vmatpush.msrb.mxu2 %v5084_v37  ;;  %1497 = vmatpush.msra.mxu1 %v5085_v38  ;;  %v5145_v37 = vld [vmem:[#allocation229_spill] sm:$0xff]  ;;  %v5146_v38 = vld [vmem:[#allocation231_spill] sm:$0xff] }
 0x296   :  { %1537 = vmatpush.msrb.mxu3 %v5086_v39  ;;  %1604 = vmatpush.msra.mxu0 %v5087_v40  ;;  %v5147_v39 = vld [vmem:[#allocation268_spill] sm:$0xff]  ;;  %v5148_v40 = vld [vmem:[#allocation186_spill] sm:$0xff] }
 0x297   :  { %1391 = vmatpush.msrb.mxu2 %v5088_v41  ;;  %1498 = vmatpush.msra.mxu1 %v5089_v42  ;;  %v5149_v41 = vld [vmem:[#allocation225_spill] sm:$0xff]  ;;  %v5150_v42 = vld [vmem:[#allocation227_spill] sm:$0xff] }
 0x298   :  { %1538 = vmatpush.msrb.mxu3 %v5090_v44  ;;  %1605 = vmatpush.msra.mxu0 %v5091_v45  ;;  %v5151_v44 = vld [vmem:[#allocation264_spill] sm:$0xff]  ;;  %v5152_v45 = vld [vmem:[#allocation182_spill] sm:$0xff] }
 0x299   :  { %2154 = vmatmul.msk.f32.vlgmr.msrb.gmra.mxu2 %vm1001_vm3, %v4153_v3  ;;  %2157 = vmatmul.msk.f32.vlgmr.msra.gmra.mxu1 %vm1001_vm3, %v4021_v10  ;;  %v5097_v3 = vld [vmem:[#allocation197_spill] sm:$0xff] }
 0x29a   :  { %1509 = vmatpush.msra.mxu2 %v5092_v46  ;;  %2159 = vmatmul.msk.f32.vlgmr.msrb.gmra.mxu3 %vm1001_vm3, %v4021_v10  ;;  %v5153_v46 = vld [vmem:[#allocation221_spill] sm:$0xff] }
 0x29b   :  { %2160 = vmatmul.msk.f32.vlgmr.msra.gmra.mxu0 %vm1001_vm3, %v4257_v43  ;;  %1616 = vmatpush.msrb.mxu1 %v5093_v47  ;;  %v5154_v47 = vld [vmem:[#allocation223_spill] sm:$0xff] }
 0x29c   :  { %1656 = vmatpush.msra.mxu3 %v5094_v48  ;;  %1723 = vmatpush.msrb.mxu0 %v5095_v49  ;;  %v5155_v48 = vld [vmem:[#allocation260_spill] sm:$0xff]  ;;  %v5156_v49 = vld [vmem:[#allocation178_spill] sm:$0xff] }
 0x29d   :  { %1510 = vmatpush.msra.mxu2 %v5096_v50  ;;  %1617 = vmatpush.msrb.mxu1 %v5097_v3  ;;  %v5157_v50 = vld [vmem:[#allocation217_spill] sm:$0xff]  ;;  %v5158_v3 = vld [vmem:[#allocation219_spill] sm:$0xff] }
 0x29e   :  { %1657 = vmatpush.msra.mxu3 %v5098_v51  ;;  %1724 = vmatpush.msrb.mxu0 %v5099_v52  ;;  %v5159_v51 = vld [vmem:[#allocation256_spill] sm:$0xff]  ;;  %v5160_v52 = vld [vmem:[#allocation174_spill] sm:$0xff] }
 0x29f   :  { %1511 = vmatpush.msra.mxu2 %v5100_v53  ;;  %1618 = vmatpush.msrb.mxu1 %v5101_v54  ;;  %v5161_v53 = vld [vmem:[#allocation213_spill] sm:$0xff]  ;;  %v5162_v54 = vld [vmem:[#allocation215_spill] sm:$0xff] }
 0x2a0   :  { %1658 = vmatpush.msra.mxu3 %v5102_v55  ;;  %1725 = vmatpush.msrb.mxu0 %v5103_v56  ;;  %v5163_v55 = vld [vmem:[#allocation252_spill] sm:$0xff]  ;;  %v5164_v56 = vld [vmem:[#allocation170_spill] sm:$0xff] }
 0x2a1   :  { %1512 = vmatpush.msra.mxu2 %v5104_v57  ;;  %1619 = vmatpush.msrb.mxu1 %v5105_v60  ;;  %v5165_v57 = vld [vmem:[#allocation209_spill] sm:$0xff]  ;;  %v5166_v60 = vld [vmem:[#allocation211_spill] sm:$0xff] }
 0x2a2   :  { %1659 = vmatpush.msra.mxu3 %v5106_v61  ;;  %1726 = vmatpush.msrb.mxu0 %v5107_v63  ;;  %v5167_v61 = vld [vmem:[#allocation248_spill] sm:$0xff]  ;;  %v5168_v63 = vld [vmem:[#allocation166_spill] sm:$0xff] }
 0x2a3   :  { %1513 = vmatpush.msra.mxu2 %v5108_v21  ;;  %1620 = vmatpush.msrb.mxu1 %v5109_v23  ;;  %v5169_v21 = vld [vmem:[#allocation205_spill] sm:$0xff]  ;;  %v1841_v23 = vrot.slane %v4021_v10, 6 }
 0x2a4   :  { %1660 = vmatpush.msra.mxu3 %v5110_v62  ;;  %1727 = vmatpush.msrb.mxu0 %v5111_v11  ;;  %v5170_v62 = vld [vmem:[#allocation207_spill] sm:$0xff]  ;;  %v5171_v11 = vld [vmem:[#allocation244_spill] sm:$0xff] }
 0x2a5   :  { %1514 = vmatpush.msra.mxu2 %v5112_v17  ;;  %1621 = vmatpush.msrb.mxu1 %v5113_v58  ;;  %v5172_v17 = vld [vmem:[#allocation242_spill] sm:$0xff]  ;;  %v5173_v58 = vld [vmem:[#allocation281_spill] sm:$0xff] }
 0x2a6   :  { %1661 = vmatpush.msra.mxu3 %v5114_v13  ;;  %1728 = vmatpush.msrb.mxu0 %v5115_v27  ;;  %v5175_v13 = vld [vmem:[#allocation238_spill] sm:$0xff]  ;;  %v5176_v27 = vld [vmem:[#allocation277_spill] sm:$0xff] }
 0x2a7   :  { %1515 = vmatpush.msra.mxu2 %v5116_v19  ;;  %1622 = vmatpush.msrb.mxu1 %v5117_v9  ;;  %v5177_v19 = vld [vmem:[#allocation279_spill] sm:$0xff]  ;;  %v5179_v9 = vld [vmem:[#allocation273_spill] sm:$0xff] }
 0x2a8   :  { %1662 = vmatpush.msra.mxu3 %v5118_v15  ;;  %1729 = vmatpush.msrb.mxu0 %v5119_v59  ;;  %v5180_v15 = vld [vmem:[#allocation275_spill] sm:$0xff]  ;;  %v5181_v59 = vld [vmem:[#allocation230_spill] sm:$0xff] }
 0x2a9   :  { %1516 = vmatpush.msra.mxu2 %v5120_v31  ;;  %1623 = vmatpush.msrb.mxu1 %v5121_v1  ;;  %v5182_v31 = vld [vmem:[#allocation269_spill] sm:$0xff]  ;;  %v5183_v1 = vld [vmem:[#allocation271_spill] sm:$0xff] }
 0x2aa   :  { %1663 = vmatpush.msra.mxu3 %v5122_v2  ;;  %1730 = vmatpush.msrb.mxu0 %v5123_v4  ;;  %v5184_v2 = vld [vmem:[#allocation226_spill] sm:$0xff]  ;;  %v5185_v4 = vld [vmem:[#allocation265_spill] sm:$0xff] }
 0x2ab   :  { %1517 = vmatpush.msra.mxu2 %v5124_v6  ;;  %1624 = vmatpush.msrb.mxu1 %v5125_v7  ;;  %v5186_v6 = vld [vmem:[#allocation267_spill] sm:$0xff]  ;;  %v5187_v7 = vld [vmem:[#allocation222_spill] sm:$0xff] }
 0x2ac   :  { %1664 = vmatpush.msra.mxu3 %v5126_v0  ;;  %1731 = vmatpush.msrb.mxu0 %v5127_v5  ;;  %v5188_v0 = vld [vmem:[#allocation261_spill] sm:$0xff]  ;;  %v5189_v5 = vld [vmem:[#allocation263_spill] sm:$0xff] }
 0x2ad   :  { %1518 = vmatpush.msra.mxu2 %v5128_v8  ;;  %1625 = vmatpush.msrb.mxu1 %v5129_v12  ;;  %v5190_v8 = vld [vmem:[#allocation218_spill] sm:$0xff]  ;;  %v5191_v12 = vld [vmem:[#allocation257_spill] sm:$0xff] }
 0x2ae   :  { %1665 = vmatpush.msra.mxu3 %v5130_v16  ;;  %1732 = vmatpush.msrb.mxu0 %v5131_v18  ;;  %v5192_v16 = vld [vmem:[#allocation259_spill] sm:$0xff]  ;;  %v5193_v18 = vld [vmem:[#allocation214_spill] sm:$0xff] }
 0x2af   :  { %2158 = vmatmul.msk.f32.vlgmr.msra.gmra.mxu2 %vm1001_vm3, %v4021_v10  ;;  %2161 = vmatmul.msk.f32.vlgmr.msrb.gmra.mxu1 %vm1001_vm3, %v4257_v43  ;;  %v5174_v10 = vld [vmem:[#allocation283_spill] sm:$0xff] }
 0x2b0   :  { %1636 = vmatpush.msrb.mxu2 %v5132_v20  ;;  %2163 = vmatmul.msk.f32.vlgmr.msra.gmra.mxu3 %vm1001_vm3, %v4257_v43  ;;  %v5194_v20 = vld [vmem:[#allocation253_spill] sm:$0xff] }
 0x2b1   :  { %2164 = vmatmul.msk.f32.vlgmr.msrb.gmra.mxu0 %vm1001_vm3, %v4308_v14  ;;  %1743 = vmatpush.msra.mxu1 %v5133_v22  ;;  %v5195_v22 = vld [vmem:[#allocation255_spill] sm:$0xff] }
 0x2b2   :  { %1783 = vmatpush.msrb.mxu3 %v5134_v24  ;;  %1850 = vmatpush.msra.mxu0 %v5135_v26  ;;  %v5196_v24 = vld [vmem:[#allocation210_spill] sm:$0xff]  ;;  %v5197_v26 = vld [vmem:[#allocation249_spill] sm:$0xff] }
 0x2b3   :  { %1637 = vmatpush.msrb.mxu2 %v5136_v28  ;;  %1744 = vmatpush.msra.mxu1 %v5137_v29  ;;  %v5198_v28 = vld [vmem:[#allocation251_spill] sm:$0xff]  ;;  %v5199_v29 = vld [vmem:[#allocation206_spill] sm:$0xff] }
 0x2b4   :  { %1784 = vmatpush.msrb.mxu3 %v5138_v30  ;;  %1851 = vmatpush.msra.mxu0 %v5139_v32  ;;  %v5200_v30 = vld [vmem:[#allocation245_spill] sm:$0xff]  ;;  %v5201_v32 = vld [vmem:[#allocation247_spill] sm:$0xff] }
 0x2b5   :  { %1638 = vmatpush.msrb.mxu2 %v5140_v33  ;;  %1745 = vmatpush.msra.mxu1 %v5141_v34  ;;  %v5202_v33 = vld [vmem:[#allocation282_spill] sm:$0xff] }
 0x2b6   :  { %1785 = vmatpush.msrb.mxu3 %v5142_v35  ;;  %1852 = vmatpush.msra.mxu0 %v5143_v25  ;;  %v5203_v34 = vld [vmem:[#allocation278_spill] sm:$0xff] }
 0x2b7   :  { %1639 = vmatpush.msrb.mxu2 %v5144_v36  ;;  %1746 = vmatpush.msra.mxu1 %v5145_v37  ;;  %v5204_v35 = vld [vmem:[#allocation274_spill] sm:$0xff] }
 0x2b8   :  { %1786 = vmatpush.msrb.mxu3 %v5146_v38  ;;  %1853 = vmatpush.msra.mxu0 %v5147_v39  ;;  %v5205_v25 = vld [vmem:[#allocation270_spill] sm:$0xff] }
 0x2b9   :  { %1640 = vmatpush.msrb.mxu2 %v5148_v40  ;;  %1747 = vmatpush.msra.mxu1 %v5149_v41  ;;  %v5206_v36 = vld [vmem:[#allocation266_spill] sm:$0xff]  ;;  %v1961_v41 = vld [vmem:[%s4659_s6 + $0x78] sm:$0xff] }
 0x2ba   :  { %1787 = vmatpush.msrb.mxu3 %v5150_v42  ;;  %1854 = vmatpush.msra.mxu0 %v5151_v44  ;;  %v5207_v37 = vld [vmem:[#allocation262_spill] sm:$0xff] }
 0x2bb   :  { %1641 = vmatpush.msrb.mxu2 %v5152_v45  ;;  %1748 = vmatpush.msra.mxu1 %v5153_v46  ;;  %v5208_v38 = vld [vmem:[#allocation258_spill] sm:$0xff]  ;;  %v1958_v45 = vld [vmem:[%s4659_s6 + $0x60] sm:$0xff]  ;;  %v1957_v46 = vld [vmem:[%s4659_s6 + $0x58] sm:$0xff] }
 0x2bc   :  { %1788 = vmatpush.msrb.mxu3 %v5154_v47  ;;  %1855 = vmatpush.msra.mxu0 %v5155_v48  ;;  %v5210_v39 = vld [vmem:[#allocation250_spill] sm:$0xff] }
 0x2bd   :  { %1642 = vmatpush.msrb.mxu2 %v5156_v49  ;;  %1749 = vmatpush.msra.mxu1 %v5157_v50  ;;  %v5211_v40 = vld [vmem:[#allocation246_spill] sm:$0xff]  ;;  %v1954_v50 = vld [vmem:[%s4659_s6 + $0x40] sm:$0xff] }
 0x2be   :  { %1789 = vmatpush.msrb.mxu3 %v5158_v3  ;;  %1856 = vmatpush.msra.mxu0 %v5159_v51  ;;  %v1960_v42 = vld [vmem:[%s4659_s6 + $0x70] sm:$0xff]  ;;  %v1959_v44 = vld [vmem:[%s4659_s6 + $0x68] sm:$0xff]  ;;  %v1977_v3 = vld [vmem:[%s4659_s6 + $0xf8] sm:$0xff] }
 0x2bf   :  { %1643 = vmatpush.msrb.mxu2 %v5160_v52  ;;  %1750 = vmatpush.msra.mxu1 %v5161_v53  ;;  %v1956_v47 = vld [vmem:[%s4659_s6 + $0x50] sm:$0xff]  ;;  %v1955_v49 = vld [vmem:[%s4659_s6 + $0x48] sm:$0xff]  ;;  %v1953_v52 = vld [vmem:[%s4659_s6 + $0x38] sm:$0xff] }
 0x2c0   :  { %1790 = vmatpush.msrb.mxu3 %v5162_v54  ;;  %1857 = vmatpush.msra.mxu0 %v5163_v55  ;;  %v1976_v51 = vld [vmem:[%s4659_s6 + $0xf0] sm:$0xff]  ;;  %v1975_v53 = vld [vmem:[%s4659_s6 + $0xe8] sm:$0xff] }
 0x2c1   :  { %1644 = vmatpush.msrb.mxu2 %v5164_v56  ;;  %1751 = vmatpush.msra.mxu1 %v5165_v57  ;;  %v1952_v55 = vld [vmem:[%s4659_s6 + $0x30] sm:$0xff]  ;;  %v1951_v56 = vld [vmem:[%s4659_s6 + $0x28] sm:$0xff] }
 0x2c2   :  { %1791 = vmatpush.msrb.mxu3 %v5166_v60  ;;  %1858 = vmatpush.msra.mxu0 %v5167_v61  ;;  %v1950_v60 = vld [vmem:[%s4659_s6 + $0x20] sm:$0xff] }
 0x2c3   :  { %1645 = vmatpush.msrb.mxu2 %v5168_v63  ;;  %1752 = vmatpush.msra.mxu1 %v5169_v21 }
 0x2c4   :  { %1792 = vmatpush.msrb.mxu3 %v5170_v62  ;;  %1859 = vmatpush.msra.mxu0 %v5171_v11  ;;  %v1974_v62 = vld [vmem:[%s4659_s6 + $0xe0] sm:$0xff]  ;;  %v1948_v11 = vld [vmem:[%s4659_s6 + $0x10] sm:$0xff] }
 0x2c5   :  { %2162 = vmatmul.msk.f32.vlgmr.msrb.gmra.mxu2 %vm1001_vm3, %v4257_v43  ;;  %2165 = vmatmul.msk.f32.vlgmr.msra.gmra.mxu1 %vm1001_vm3, %v4308_v14  ;;  %v5178_v43 = vld [vmem:[#allocation234_spill] sm:$0xff] }
 0x2c6   :  { %1763 = vmatpush.msra.mxu2 %v5172_v17  ;;  %2167 = vmatmul.msk.f32.vlgmr.msrb.gmra.mxu3 %vm1001_vm3, %v4308_v14  ;;  %v1973_v17 = vld [vmem:[%s4659_s6 + $0xd8] sm:$0xff] }
 0x2c7   :  { %2168 = vmatmul.msk.f32.vlgmr.msra.gmra.mxu0 %vm1001_vm3, %v1841_v23  ;;  %1870 = vmatpush.msrb.mxu1 %v5173_v58  ;;  %v2008_v58 = vld [vmem:[%s4659_s6 + $0x1f0] sm:$0xf] }
 0x2c8   :  { %1910 = vmatpush.msra.mxu3 %v5174_v10  ;;  %1764 = vmatpush.msra.mxu2 %v5175_v13  ;;  %v1947_v10 = vld [vmem:[%s4659_s6 + $0x8] sm:$0xff]  ;;  %v1972_v13 = vld [vmem:[%s4659_s6 + $0xd0] sm:$0xff] }
 0x2c9   :  { %1871 = vmatpush.msrb.mxu1 %v5176_v27  ;;  %2021 = vmatpush.msrb.mxu0 %v1961_v41  ;;  %v2007_v27 = vld [vmem:[%s4659_s6 + $0x1e8] sm:$0xff]  ;;  %v1997_v41 = vld [vmem:[%s4659_s6 + $0x198] sm:$0xff] }
 0x2ca   :  { %1911 = vmatpush.msra.mxu3 %v5177_v19  ;;  %1765 = vmatpush.msra.mxu2 %v5178_v43  ;;  %v1946_v19 = vld [vmem:[%s4659_s6] sm:$0xff]  ;;  %v1971_v43 = vld [vmem:[%s4659_s6 + $0xc8] sm:$0xff] }
 0x2cb   :  { %1872 = vmatpush.msrb.mxu1 %v5179_v9  ;;  %2022 = vmatpush.msrb.mxu0 %v1960_v42  ;;  %v2006_v9 = vld [vmem:[%s4659_s6 + $0x1e0] sm:$0xff] }
 0x2cc   :  { %1912 = vmatpush.msra.mxu3 %v5180_v15  ;;  %1766 = vmatpush.msra.mxu2 %v5181_v59  ;;  %v1970_v15 = vld [vmem:[%s4659_s6 + $0xc0] sm:$0xff] }
 0x2cd   :  { %1873 = vmatpush.msrb.mxu1 %v5182_v31  ;;  %2023 = vmatpush.msrb.mxu0 %v1959_v44  ;;  %v1990_v44 = vld [vmem:[%s4659_s6 + $0x160] sm:$0xff] }
 0x2ce   :  { %1913 = vmatpush.msra.mxu3 %v5183_v1  ;;  %1767 = vmatpush.msra.mxu2 %v5184_v2  ;;  %v2005_v1 = vld [vmem:[%s4659_s6 + $0x1d8] sm:$0xff] }
 0x2cf   :  { %1874 = vmatpush.msrb.mxu1 %v5185_v4  ;;  %2024 = vmatpush.msrb.mxu0 %v1958_v45  ;;  %v1969_v4 = vld [vmem:[%s4659_s6 + $0xb8] sm:$0xff] }
 0x2d0   :  { %1914 = vmatpush.msra.mxu3 %v5186_v6  ;;  %1768 = vmatpush.msra.mxu2 %v5187_v7  ;;  %v2004_v6 = vld [vmem:[%s4659_s6 + $0x1d0] sm:$0xff] }
 0x2d1   :  { %1875 = vmatpush.msrb.mxu1 %v5188_v0  ;;  %2025 = vmatpush.msrb.mxu0 %v1957_v46  ;;  %v1968_v0 = vld [vmem:[%s4659_s6 + $0xb0] sm:$0xff] }
 0x2d2   :  { %1915 = vmatpush.msra.mxu3 %v5189_v5  ;;  %1769 = vmatpush.msra.mxu2 %v5190_v8  ;;  %v4451_v54 = vpop.f32.mrf.mxu1  ;;  %v2003_v5 = vld [vmem:[%s4659_s6 + $0x1c8] sm:$0xff] }
 0x2d3   :  { %1876 = vmatpush.msrb.mxu1 %v5191_v12  ;;  %v4431_v48 = vpop.f32.mrf.mxu0  ;;  %2026 = vmatpush.msrb.mxu0 %v1956_v47  ;;  %v1967_v8 = vld [vmem:[%s4659_s6 + $0xa8] sm:$0xff]  ;;  %v2002_v12 = vld [vmem:[%s4659_s6 + $0x1c0] sm:$0xff]  ;;  %v1996_v47 = vld [vmem:[%s4659_s6 + $0x190] sm:$0xff] }
 0x2d4   :  { %1916 = vmatpush.msra.mxu3 %v5192_v16  ;;  %1770 = vmatpush.msra.mxu2 %v5193_v18  ;;  %v1966_v16 = vld [vmem:[%s4659_s6 + $0xa0] sm:$0xff]  ;;  %v2001_v18 = vld [vmem:[%s4659_s6 + $0x1b8] sm:$0xff] }
 0x2d5   :  { %1877 = vmatpush.msrb.mxu1 %v5194_v20  ;;  %2027 = vmatpush.msrb.mxu0 %v1955_v49  ;;  %v1989_v49 = vld [vmem:[%s4659_s6 + $0x158] sm:$0xff] }
 0x2d6   :  { %1917 = vmatpush.msra.mxu3 %v5195_v22  ;;  %1771 = vmatpush.msra.mxu2 %v5196_v24 }
 0x2d7   :  { %1878 = vmatpush.msrb.mxu1 %v5197_v26  ;;  %2028 = vmatpush.msrb.mxu0 %v1954_v50 }
 0x2d8   :  { %1918 = vmatpush.msra.mxu3 %v5198_v28  ;;  %1772 = vmatpush.msra.mxu2 %v5199_v29  ;;  %v1021_v7 = vpop.f32.mrf.mxu2  ;;  %v1965_v29 = vld [vmem:[%s4659_s6 + $0x98] sm:$0xff] }
 0x2d9   :  { %1879 = vmatpush.msrb.mxu1 %v5200_v30  ;;  %2166 = vmatmul.msk.f32.vlgmr.msra.gmra.mxu2 %vm1001_vm3, %v4308_v14  ;;  %v5209_v14 = vld [vmem:[#allocation254_spill] sm:$0xff]  ;;  %v4464_v61 = vpop.f32.mrf.mxu3  ;;  %v1104_v24 = vadd.f32 %v4431_v48, %v1021_v7  ;;  %v4588_v48 = vld [vmem:[%s4658_s5] sm:$0xf] }
 0x2da   :  { %1919 = vmatpush.msra.mxu3 %v5201_v32  ;;  %2169 = vmatmul.msk.f32.vlgmr.msrb.gmra.mxu1 %vm1001_vm3, %v1841_v23  ;;  %v2000_v30 = vld [vmem:[%s4659_s6 + $0x1b0] sm:$0xff]  ;;  %v1993_v32 = vld [vmem:[%s4659_s6 + $0x178] sm:$0xff] }
 0x2db   :  { %1890 = vmatpush.msrb.mxu2 %v5202_v33  ;;  %2171 = vmatmul.msk.f32.vlgmr.msra.gmra.mxu3 %vm1001_vm3, %v1841_v23  ;;  %v1964_v33 = vld [vmem:[%s4659_s6 + $0x90] sm:$0xff] }
 0x2dc   :  { %2041 = vmatpush.msra.mxu1 %v1977_v3  ;;  %2029 = vmatpush.msrb.mxu0 %v1953_v52  ;;  %v4459_v57 = vpop.f32.mrf.mxu0  ;;  %v1988_v52 = vld [vmem:[%s4659_s6 + $0x150] sm:$0xff] }
 0x2dd   :  { %1891 = vmatpush.msrb.mxu2 %v5203_v34  ;;  %2172 = vmatpush.msk.msrb.mxu3 %vm2017_vm4, %v2008_v58  ;;  %v1999_v34 = vld [vmem:[%s4659_s6 + $0x1a8] sm:$0xff] }
 0x2de   :  { %2042 = vmatpush.msra.mxu1 %v1976_v51  ;;  %2030 = vmatpush.msrb.mxu0 %v1952_v55  ;;  %v1995_v51 = vld [vmem:[%s4659_s6 + $0x188] sm:$0xff]  ;;  %v1930_v55 = vperm.slane %v4588_v48, 0 }
 0x2df   :  { %1892 = vmatpush.msrb.mxu2 %v5204_v35  ;;  %2083 = vmatpush.msrb.mxu3 %v2007_v27  ;;  %v1992_v35 = vld [vmem:[%s4659_s6 + $0x170] sm:$0xff] }
 0x2e0   :  { %2043 = vmatpush.msra.mxu1 %v1975_v53  ;;  %2031 = vmatpush.msrb.mxu0 %v1951_v56  ;;  %v1994_v56 = vld [vmem:[%s4659_s6 + $0x180] sm:$0xff] }
 0x2e1   :  { %1893 = vmatpush.msrb.mxu2 %v5205_v25  ;;  %2084 = vmatpush.msrb.mxu3 %v2006_v9  ;;  %v1289_v25 = vadd.f32 %v4459_v57, %v1104_v24  ;;  %v1987_v57 = vld [vmem:[%s4659_s6 + $0x148] sm:$0xff]  ;;  %v1982_v9 = vld [vmem:[%s4659_s6 + $0x120] sm:$0xff] }
 0x2e2   :  { %2032 = vmatpush.msrb.mxu0 %v1950_v60  ;;  %2044 = vmatpush.msra.mxu1 %v1974_v62 }
 0x2e3   :  { %1894 = vmatpush.msrb.mxu2 %v5206_v36  ;;  %2085 = vmatpush.msrb.mxu3 %v2005_v1  ;;  %v1963_v36 = vld [vmem:[%s4659_s6 + $0x88] sm:$0xff] }
 0x2e4   :  { %2045 = vmatpush.msra.mxu1 %v1973_v17 }
 0x2e5   :  { %1895 = vmatpush.msrb.mxu2 %v5207_v37  ;;  %2086 = vmatpush.msrb.mxu3 %v2004_v6  ;;  %v1998_v37 = vld [vmem:[%s4659_s6 + $0x1a0] sm:$0xff] }
 0x2e6   :  { %2046 = vmatpush.msra.mxu1 %v1972_v13  ;;  %v4540_v26 = vpop.f32.mrf.mxu2 }
 0x2e7   :  { %1896 = vmatpush.msrb.mxu2 %v5208_v38  ;;  %2087 = vmatpush.msrb.mxu3 %v2003_v5  ;;  %v1979_v5 = vld [vmem:[%s4659_s6 + $0x108] sm:$0xff] }
 0x2e8   :  { %2047 = vmatpush.msra.mxu1 %v1971_v43  ;;  %v1983_v43 = vld [vmem:[%s4659_s6 + $0x128] sm:$0xff] }
 0x2e9   :  { %1897 = vmatpush.msrb.mxu2 %v5209_v14  ;;  %v4466_v63 = vpop.f32.mrf.mxu1  ;;  %2088 = vmatpush.msrb.mxu3 %v2002_v12  ;;  %v1991_v14 = vld [vmem:[%s4659_s6 + $0x168] sm:$0xff] }
 0x2ea   :  { %v4468_v21 = vpop.f32.mrf.mxu0  ;;  %2048 = vmatpush.msra.mxu1 %v1970_v15 }
 0x2eb   :  { %1898 = vmatpush.msrb.mxu2 %v5210_v39  ;;  %v4506_v59 = vpop.f32.mrf.mxu3  ;;  %2089 = vmatpush.msrb.mxu3 %v2001_v18  ;;  %v1416_v39 = vadd.f32 %v4468_v21, %v1289_v25 }
 0x2ec   :  { %2049 = vmatpush.msra.mxu1 %v1969_v4 }
 0x2ed   :  { %1899 = vmatpush.msrb.mxu2 %v5211_v40  ;;  %2090 = vmatpush.msrb.mxu3 %v2000_v30  ;;  %v1962_v40 = vld [vmem:[%s4659_s6 + $0x80] sm:$0xff] }
 0x2ee   :  { %2170 = vmatmul.msk.f32.vlgmr.msrb.gmra.mxu2 %vm1001_vm3, %v1841_v23  ;;  %v1949_v23 = vld [vmem:[%s4659_s6 + $0x18] sm:$0xff]  ;;  %2050 = vmatpush.msra.mxu1 %v1968_v0  ;;  %v1980_v0 = vld [vmem:[%s4659_s6 + $0x110] sm:$0xff] }
 0x2ef   :  { %2033 = vmatpush.msrb.mxu0 %v1949_v23  ;;  %2061 = vmatpush.msra.mxu2 %v1993_v32  ;;  %v1986_v23 = vld [vmem:[%s4659_s6 + $0x140] sm:$0xff] }
 0x2f0   :  { %2051 = vmatpush.msra.mxu1 %v1967_v8  ;;  %2091 = vmatpush.msrb.mxu3 %v1999_v34  ;;  %v4593_v50 = vpop.f32.mrf.mxu2 }
 0x2f1   :  { %2034 = vmatpush.msrb.mxu0 %v1948_v11  ;;  %2062 = vmatpush.msra.mxu2 %v1992_v35  ;;  %v1985_v11 = vld [vmem:[%s4659_s6 + $0x138] sm:$0xff] }
 0x2f2   :  { %2052 = vmatpush.msra.mxu1 %v1966_v16  ;;  %2092 = vmatpush.msrb.mxu3 %v1998_v37 }
 0x2f3   :  { %2035 = vmatpush.msrb.mxu0 %v1947_v10  ;;  %2063 = vmatpush.msra.mxu2 %v1991_v14  ;;  %v1984_v10 = vld [vmem:[%s4659_s6 + $0x130] sm:$0xff]  ;;  %v1144_v14 = vadd.f32 %v4593_v50, %v4540_v26 }
 0x2f4   :  { %2053 = vmatpush.msra.mxu1 %v1965_v29  ;;  %2093 = vmatpush.msrb.mxu3 %v1997_v41 }
 0x2f5   :  { %2036 = vmatpush.msrb.mxu0 %v1946_v19  ;;  %v4537_v22 = vpop.f32.mrf.mxu3  ;;  %2064 = vmatpush.msra.mxu2 %v1990_v44  ;;  %v1124_v19 = vadd.f32 %v4466_v63, %v4451_v54  ;;  %v1981_v54 = vld [vmem:[%s4659_s6 + $0x118] sm:$0xff]  ;;  %v1164_v63 = vadd.f32 %v4506_v59, %v4464_v61  ;;  %v1931_v61 = vperm.slane %v4588_v48, 1  ;;  %v1978_v59 = vld [vmem:[%s4659_s6 + $0x100] sm:$0xff] }
 0x2f6   :  { %2054 = vmatpush.msra.mxu1 %v1964_v33  ;;  %2094 = vmatpush.msrb.mxu3 %v1996_v47 }
 0x2f7   :  { %v4511_v2 = vpop.f32.mrf.mxu1  ;;  %2065 = vmatpush.msra.mxu2 %v1989_v49  ;;  %v1292_v8 = vadd.f32 %v4537_v22, %v1164_v63  ;;  %v1933_v22 = vperm.slane %v4588_v48, 3 }
 0x2f8   :  { %2055 = vmatpush.msra.mxu1 %v1963_v36  ;;  %2095 = vmatpush.msrb.mxu3 %v1995_v51  ;;  %v1290_v15 = vadd.f32 %v4511_v2, %v1124_v19 }
 0x2f9   :  { %2066 = vmatpush.msra.mxu2 %v1988_v52  ;;  %v2178_v52 = vld [vmem:[%s4660_s7] ss:$0 sm:$0xff] }
 0x2fa   :  { %2056 = vmatpush.msra.mxu1 %v1962_v40  ;;  %2096 = vmatpush.msrb.mxu3 %v1994_v56 }
 0x2fb   :  { %2067 = vmatpush.msra.mxu2 %v1987_v57 }
 0x2fd   :  { %2068 = vmatpush.msra.mxu2 %v1986_v23 }
 0x2ff   :  { %2069 = vmatpush.msra.mxu2 %v1985_v11 }
 0x300   :  { %v4542_v28 = vpop.f32.mrf.mxu1 }
 0x301   :  { %2070 = vmatpush.msra.mxu2 %v1984_v10  ;;  %v1417_v4 = vadd.f32 %v4542_v28, %v1290_v15 }
 0x302   :  { %v1480_v31 = vpop.f32.mrf.mxu0 }
 0x303   :  { %v1543_v45 = vadd.f32 %v1480_v31, %v1416_v39  ;;  %2071 = vmatpush.msra.mxu2 %v1983_v43 }
 0x305   :  { %2072 = vmatpush.msra.mxu2 %v1982_v9 }
 0x306   :  { %v1266_v13 = vpop.f32.mrf.mxu2 }
 0x307   :  { %v1413_v42 = vpop.f32.mrf.mxu3  ;;  %2073 = vmatpush.msra.mxu2 %v1981_v54  ;;  %v1291_v39 = vadd.f32 %v1266_v13, %v1144_v14 }
 0x308   :  { %v1419_v18 = vadd.f32 %v1413_v42, %v1292_v8 }
 0x309   :  { %2074 = vmatpush.msra.mxu2 %v1980_v0 }
 0x30b   :  { %2075 = vmatpush.msra.mxu2 %v1979_v5 }
 0x30d   :  { %2076 = vmatpush.msra.mxu2 %v1978_v59 }
 0x316   :  { %v1500_v46 = vpop.f32.mrf.mxu1 }
 0x317   :  { %v1544_v7 = vadd.f32 %v1500_v46, %v1417_v4  ;;  %v1932_v46 = vperm.slane %v4588_v48, 2 }
 0x318   :  { %v1607_v20 = vpop.f32.mrf.mxu0 }
 0x319   :  { %v1670_v3 = vadd.f32 %v1607_v20, %v1543_v45 }
 0x31c   :  { %v1393_v6 = vpop.f32.mrf.mxu2 }
 0x31d   :  { %v1540_v62 = vpop.f32.mrf.mxu3  ;;  %v1418_v41 = vadd.f32 %v1393_v6, %v1291_v39 }
 0x31e   :  { %v1546_v28 = vadd.f32 %v1540_v62, %v1419_v18 }
 0x32c   :  { %v1627_v17 = vpop.f32.mrf.mxu1 }
 0x32d   :  { %v1671_v2 = vadd.f32 %v1627_v17, %v1544_v7 }
 0x32e   :  { %v1734_v38 = vpop.f32.mrf.mxu0 }
 0x32f   :  { %v1797_v53 = vadd.f32 %v1734_v38, %v1670_v3 }
 0x332   :  { %v1520_v29 = vpop.f32.mrf.mxu2 }
 0x333   :  { %v1667_v31 = vpop.f32.mrf.mxu3  ;;  %v1545_v42 = vadd.f32 %v1520_v29, %v1418_v41 }
 0x334   :  { %v1673_v32 = vadd.f32 %v1667_v31, %v1546_v28 }
 0x342   :  { %v1754_v1 = vpop.f32.mrf.mxu1 }
 0x343   :  { %v1798_v12 = vadd.f32 %v1754_v1, %v1671_v2 }
 0x344   :  { %v1861_v60 = vpop.f32.mrf.mxu0 }
 0x345   :  { %v1924_v21 = vadd.f32 %v1861_v60, %v1797_v53 }
 0x347   :  { %v1938_v58 = vadd.f32 %v1930_v55, %v1924_v21 }
 0x348   :  { %v1647_v36 = vpop.f32.mrf.mxu2 }
 0x349   :  { %v1942_v27 = vmax.f32 %v1938_v58, 0.0  ;;  %v1794_v16 = vpop.f32.mrf.mxu3  ;;  %v1672_v44 = vadd.f32 %v1647_v36, %v1545_v42 }
 0x34a   :  { %v1800_v34 = vadd.f32 %v1794_v16, %v1673_v32 }
 0x34b   :  { %2037 = vmatmul.f32.vlgmr.msrb.gmra.mxu0 %v1942_v27 }
 0x357   :  { %v1881_v20 = vpop.f32.mrf.mxu1 }
 0x358   :  { %v1925_v24 = vadd.f32 %v1881_v20, %v1798_v12 }
 0x35a   :  { %v1939_v30 = vadd.f32 %v1931_v61, %v1925_v24 }
 0x35c   :  { %v1943_v33 = vmax.f32 %v1939_v30, 0.0  ;;  %v1774_v40 = vpop.f32.mrf.mxu2 }
 0x35d   :  { %v1799_v45 = vadd.f32 %v1774_v40, %v1672_v44 }
 0x35e   :  { %v1921_v35 = vpop.f32.mrf.mxu3  ;;  %2057 = vmatmul.f32.vlgmr.msra.gmra.mxu1 %v1943_v33 }
 0x35f   :  { %v1927_v25 = vadd.f32 %v1921_v35, %v1800_v34 }
 0x361   :  { %v1941_v37 = vadd.f32 %v1933_v22, %v1927_v25 }
 0x363   :  { %v1945_v38 = vmax.f32 %v1941_v37, 0.0 }
 0x365   :  { %2173 = vmatmul.msk.f32.vlgmr.msrb.gmra.mxu3 %vm2013_vm5, %v1945_v38 }
 0x371   :  { %v1901_v47 = vpop.f32.mrf.mxu2 }
 0x372   :  { %v1926_v49 = vadd.f32 %v1901_v47, %v1799_v45 }
 0x374   :  { %v1940_v3 = vadd.f32 %v1932_v46, %v1926_v49 }
 0x376   :  { %v1944_v51 = vmax.f32 %v1940_v3, 0.0 }
 0x378   :  { %2077 = vmatmul.f32.vlgmr.msra.gmra.mxu2 %v1944_v51 }
 0x3c8   :  { %v2038_v53 = vpop.f32.mrf.mxu0 }
 0x3c9   :  { %v2039_v26 = vadd.f32 %v2178_v52, %v2038_v53 }
 0x3db   :  { %v2058_v55 = vpop.f32.mrf.mxu1 }
 0x3dc   :  { %v2059_v50 = vadd.f32 %v2058_v55, %v2039_v26 }
 0x3e8   :  { %v2098_v57 = vpop.f32.mrf.mxu3 }
 0x3fb   :  { %v2078_v56 = vpop.f32.mrf.mxu2 }
 0x3fc   :  { %v2079_v48 = vadd.f32 %v2078_v56, %v2059_v50 }
 0x3fe   :  { %v2099_v60 = vadd.f32 %v2098_v57, %v2079_v48 }
 0x400   :  { %2102 = vst.msk [vmem:[#allocation4] sm:$0x3] %vm2101_vm6, %v2099_v60 }
 0x401   :  { %2113 = dma.vmem_to_hbm [thread:$0]  %s2109_s28, 32, %s2111_s30, [#allocation5]  }
 0x402   :  { %2205 = dma.done.wait [#allocation5], 32  }
 0x403   :  { %2206 = vsyncadd [#allocation5], 4294967264 }
 0x404   :  { %2118 = vsyncpa [#allocation5], 1 }
 0x405   :  { %2119 = vsyncmov [#allocation3] }
 0x408   :  { %s2120_s7 = vpop.sfrf %2119 }
 0x409   :  { %p2174_p0 = scmp.ne.s32.totalorder %s2120_s7, 0 }
 0x40b   :  { %2124 = shalt.err (%p2174_p0)  }

</bundles_post_ra>
